<compile_context>
chip_gen: v6e
topology: v6e:2x2x1
jax: 0.10.0
libtpu: 0.0.40
codegen_flags: <defaults>
</compile_context>

<pallas_src>
import numpy as np

import jax
import jax.numpy as jnp
from jax import lax
from jax.experimental import pallas as pl
from jax.experimental.pallas import tpu as pltpu


IMGCH = 3
D_DIM = 8
BLOCKS = 1
LRELU_SLOPE = 0.2
LANE = 128                      # pad the final-layer N to this (lane-dense store)
MAX_FOLD_BYTES = 12 << 20       # guard: max bf16 bytes per folded conv matrix


def _round_up(x, m):
    return (x + m - 1) // m * m


def _elementwise_dtype():
    """bf16 elementwise on v6e/v7x (packed bf16 VPU); f32 on v5* (no bf16 VALU)."""
    try:
        kind = jax.devices()[0].device_kind.lower()
    except Exception:
        kind = ""
    return jnp.float32 if "v5" in kind else jnp.bfloat16


# ------------------------------ Pallas kernel --------------------------------
# One grid step processes one batch tile end-to-end:
#   x:(bt, 768) --bf16 GEMM + bias + LeakyReLU--> (bt, 512)
#               --bf16 GEMM        + LeakyReLU--> (bt, 256)
#               --bf16 GEMM + bias            --> (bt, 128)   (only col 0 is real)
# All intermediates stay in vregs/VMEM; only the (bt, 128) slab goes back to HBM.

def _make_fused_kernel(has_bias, has_act, slope, ew_dtype):
    n_layers = len(has_bias)

    def kernel(*refs):
        x_ref = refs[0]
        o_ref = refs[-1]
        # Cast the loaded tile straight to bf16 (no f32 intermediate copy).
        h = x_ref[...].astype(jnp.bfloat16)
        idx = 1
        for li, (hb, ha) in enumerate(zip(has_bias, has_act)):
            m_ref = refs[idx]
            idx += 1
            # bf16 operands into the MXU, f32 accumulation.
            acc = jnp.dot(h, m_ref[...], preferred_element_type=jnp.float32)
            if li == n_layers - 1:
                if hb:
                    acc = acc + refs[idx][...]          # (1, 128) f32 bias row
                    idx += 1
                o_ref[...] = acc.astype(o_ref.dtype)    # lane-dense (bt, 128) store
            else:
                acc = acc.astype(ew_dtype)              # bf16 elementwise on v6e/v7x
                if hb:
                    acc = acc + refs[idx][...]          # (1, N) bias in ew_dtype
                    idx += 1
                if ha:
                    acc = jnp.where(acc >= 0, acc, slope * acc)   # LeakyReLU(0.2)
                h = acc.astype(jnp.bfloat16)
    return kernel


def _vmem_limit_bytes(fused, bt, k0, n_out):
    w_bytes = sum(int(l["m"].size) * l["m"].dtype.itemsize for l in fused)
    b_bytes = sum(int(l["b"].size) * l["b"].dtype.itemsize
                  for l in fused if l["b"] is not None)
    io_bytes = 2 * bt * (k0 + n_out) * 4      # double-buffered x / out tiles (f32)
    need = 2 * (w_bytes + b_bytes) + io_bytes + (4 << 20)
    return int(min(max(need, 32 << 20), 56 << 20))   # <= v7x 64 MiB physical


def discriminator_forward(fused, x_nchw, ew_dtype):
    """single_forward(inp_a, first_a) for auxclas=False -> returns (score,)."""
    B, C, H, W = x_nchw.shape
    K0 = C * H * W
    assert fused[0]["m"].shape[0] == K0, (fused[0]["m"].shape, K0)

    # Flatten NCHW (pure reshape, no transpose) and pad batch to the tile size.
    x = x_nchw.reshape(B, K0).astype(jnp.float32)

    # Batch tiling: multiples of 16 (bf16 row packing), bigger tiles for big B,
    # but keep >= 2 grid steps once Bp >= 32 so v7x's two TCs both get work.
    Bp = _round_up(B, 16)
    if Bp >= 512:
        bt = 256
    elif Bp >= 256:
        bt = 128
    elif Bp >= 32:
        bt = _round_up(Bp // 2, 16)
    else:
        bt = Bp
    Bp = _round_up(Bp, bt)
    if Bp != B:
        x = jnp.pad(x, ((0, Bp - B), (0, 0)))

    n_out = fused[-1]["m"].shape[1]     # lane-padded (128)

    operands = [x]
    in_specs = [pl.BlockSpec((bt, K0), lambda i: (i, 0))]
    has_bias, has_act = [], []
    for layer in fused:
        k, n = layer["m"].shape
        operands.append(layer["m"])                                # bf16 conv matrix
        in_specs.append(pl.BlockSpec((k, n), lambda i: (0, 0)))    # resident across grid
        if layer["b"] is not None:
            nb = layer["b"].shape[1]
            operands.append(layer["b"])                            # (1, N) bias row
            in_specs.append(pl.BlockSpec((1, nb), lambda i: (0, 0)))
        has_bias.append(layer["b"] is not None)
        has_act.append(layer["act"])

    kernel = _make_fused_kernel(tuple(has_bias), tuple(has_act), LRELU_SLOPE, ew_dtype)

    out = pl.pallas_call(
        kernel,
        out_shape=jax.ShapeDtypeStruct((Bp, n_out), jnp.float32),
        grid=(Bp // bt,),
        in_specs=in_specs,
        out_specs=pl.BlockSpec((bt, n_out), lambda i: (i, 0)),
        compiler_params=pltpu.CompilerParams(
            dimension_semantics=("parallel",),
            vmem_limit_bytes=_vmem_limit_bytes(fused, bt, K0, n_out),
        ),
    )(*operands)

    # predict_src ends with Reshape(-1, 1); auxclas=False -> 1-tuple.
    return (out[:B, :1],)


# -------------------- parameter setup (plain JAX / numpy) --------------------

def spectral_norm(w, key, n_power_iterations=1, eps=1e-12):
    """PyTorch-style spectral norm (one power iteration, deterministic fresh u)."""
    out_c = w.shape[0]
    w_mat = w.reshape(out_c, -1)
    u = jax.random.normal(key, (out_c,), dtype=w.dtype)
    u = u / (jnp.linalg.norm(u) + eps)
    v = None
    for _ in range(n_power_iterations):
        v = w_mat.T @ u
        v = v / (jnp.linalg.norm(v) + eps)
        u = w_mat @ v
        u = u / (jnp.linalg.norm(u) + eps)
    sigma = u @ (w_mat @ v)
    return w / sigma


def init_conv_params(key):
    """DCGAN-style weight_init: conv weights ~ N(0, 0.02), biases = 0."""
    keys = jax.random.split(key, 4 + 2 * BLOCKS)
    params = {}

    # first_a: SpectralNorm(Conv2d(imgch, d_dim, 5, stride=2, padding=2)) (bias=True)
    w = 0.02 * jax.random.normal(keys[0], (D_DIM, IMGCH, 5, 5), jnp.float32)
    params["first_w"] = spectral_norm(w, keys[1])
    params["first_b"] = jnp.zeros((D_DIM,), jnp.float32)

    # main: SpectralNorm(Conv2d(d*m, d*2m, 5, s=2, p=2, bias=False)) + Norm('none') + LeakyReLU
    main = []
    for it in range(BLOCKS):
        mult = 2 ** it
        cin, cout = D_DIM * mult, D_DIM * mult * 2
        w = 0.02 * jax.random.normal(keys[2 + 2 * it], (cout, cin, 5, 5), jnp.float32)
        main.append(spectral_norm(w, keys[3 + 2 * it]))
    params["main_w"] = main

    # predict_src: SpectralNorm(Conv2d(d_dim*2**blocks, 1, 4)) + Reshape(-1, 1)
    mult = 2 ** BLOCKS
    w = 0.02 * jax.random.normal(keys[2 + 2 * BLOCKS], (1, D_DIM * mult, 4, 4), jnp.float32)
    params["src_w"] = spectral_norm(w, keys[3 + 2 * BLOCKS])
    params["src_b"] = jnp.zeros((1,), jnp.float32)
    return params


def conv_as_matmul(w, bias, H, W, stride, pad):
    """Fold Conv2d(weight=w, stride, pad) over an (H, W) input into a dense matrix M so
    that  flatten_nchw(conv(x)) == flatten_nchw(x) @ M (+ b_full).
    Flatten order on both sides is NCHW: index = c*(H*W) + h*W + w.
    Weight layout is PyTorch's (Cout, Cin, KH, KW). Built once at setup time."""
    w = np.asarray(w, np.float32)
    Cout, Cin, KH, KW = w.shape
    OH = (H + 2 * pad - KH) // stride + 1
    OW = (W + 2 * pad - KW) // stride + 1
    M = np.zeros((Cin * H * W, Cout * OH * OW), np.float32)
    for kh in range(KH):
        for kw in range(KW):
            wk = w[:, :, kh, kw].T                      # (Cin, Cout)
            for oh in range(OH):
                ih = oh * stride + kh - pad
                if ih < 0 or ih >= H:
                    continue
                for ow in range(OW):
                    iw = ow * stride + kw - pad
                    if iw < 0 or iw >= W:
                        continue
                    # rows: ci*H*W + ih*W + iw ; cols: co*OH*OW + oh*OW + ow
                    M[ih * W + iw::H * W, oh * OW + ow::OH * OW] = wk
    b_full = None if bias is None else np.repeat(np.asarray(bias, np.float32), OH * OW)
    return M, b_full, (OH, OW)


def build_fused_params(conv_params, H, W, ew_dtype):
    """Fold each (already spectrally-normalised) conv into dense matrix form.

    Returns:
      fused:      device-side layers for the kernel (bf16 matrices, biases; final
                  layer lane-padded to N=128).
      ref_layers: host-side (numpy, f32, un-padded) copies for correctness refs only.
    """
    layers = []
    h, w = H, W
    m, b, (h, w) = conv_as_matmul(conv_params["first_w"], conv_params["first_b"], h, w, 2, 2)
    layers.append((m, b, True))
    for wt in conv_params["main_w"]:
        m, _, (h, w) = conv_as_matmul(wt, None, h, w, 2, 2)
        layers.append((m, None, True))
    m, b, (h, w) = conv_as_matmul(conv_params["src_w"], conv_params["src_b"], h, w, 1, 0)
    layers.append((m, b, False))

    # Size guard: the dense fold only works for small spatial sizes; it stops
    # fitting v7x's 64 MiB VMEM long before v5e/v6e's 128 MiB.
    for mm, _, _ in layers:
        if mm.size * 2 > MAX_FOLD_BYTES:
            raise NotImplementedError(
                "folded conv matrix too large for VMEM-resident dense fold; "
                "use a tiled shifted-matmul conv for this spatial size")

    ref_layers = [(mm.copy(), None if bb is None else bb.copy(), act)
                  for mm, bb, act in layers]

    # Lane-pad the final layer's N from 1 to LANE: clean MXU tile + lane-dense store.
    m_last, b_last, act_last = layers[-1]
    n_last = m_last.shape[1]
    if n_last < LANE:
        m_pad = np.zeros((m_last.shape[0], LANE), np.float32)
        m_pad[:, :n_last] = m_last
        b_pad = None
        if b_last is not None:
            b_pad = np.zeros((LANE,), np.float32)
            b_pad[:n_last] = b_last
        layers[-1] = (m_pad, b_pad, act_last)

    fused = []
    n_layers = len(layers)
    for i, (mm, bb, act) in enumerate(layers):
        last = (i == n_layers - 1)
        bias_dtype = jnp.float32 if last else ew_dtype
        fused.append({
            "m": jnp.asarray(mm, jnp.bfloat16),
            "b": None if bb is None else
                 jnp.asarray(bb, jnp.float32).astype(bias_dtype).reshape(1, -1),
            "act": act,
        })
    return fused, ref_layers


# ----------------------------- references (checks) ----------------------------

def _leaky(x):
    return jnp.where(x >= 0, x, LRELU_SLOPE * x)


def discriminator_forward_ref(conv_params, x):
    """Plain-JAX f32 conv reference of the PyTorch forward (correctness check only)."""
    dn = ("NCHW", "OIHW", "NCHW")
    h = lax.conv_general_dilated(x, conv_params["first_w"], (2, 2), [(2, 2), (2, 2)],
                                 dimension_numbers=dn, precision=lax.Precision.HIGHEST)
    h = _leaky(h + conv_params["first_b"][None, :, None, None])
    for w in conv_params["main_w"]:
        h = lax.conv_general_dilated(h, w, (2, 2), [(2, 2), (2, 2)],
                                     dimension_numbers=dn, precision=lax.Precision.HIGHEST)
        h = _leaky(h)
    s = lax.conv_general_dilated(h, conv_params["src_w"], (1, 1), [(0, 0), (0, 0)],
                                 dimension_numbers=dn, precision=lax.Precision.HIGHEST)
    s = s + conv_params["src_b"][None, :, None, None]
    return s.reshape(-1, 1)


def matmul_chain_f32(ref_layers, x_flat):
    """f32 GEMM chain (validates the conv->matmul folding against the conv ref)."""
    h = jnp.asarray(x_flat, jnp.float32)
    for m, b, act in ref_layers:
        h = jnp.dot(h, jnp.asarray(m, jnp.float32), precision=lax.Precision.HIGHEST)
        if b is not None:
            h = h + jnp.asarray(b, jnp.float32)[None, :]
        if act:
            h = _leaky(h)
    return h


def matmul_chain_bf16(ref_layers, x_flat, ew_dtype):
    """Mirror of the kernel's compute (bf16 MXU, ew_dtype elementwise) in plain JAX."""
    h = jnp.asarray(x_flat, jnp.float32).astype(jnp.bfloat16)
    n = len(ref_layers)
    out = None
    for i, (m, b, act) in enumerate(ref_layers):
        acc = jnp.dot(h, jnp.asarray(m, jnp.float32).astype(jnp.bfloat16),
                      preferred_element_type=jnp.float32)
        if i == n - 1:
            if b is not None:
                acc = acc + jnp.asarray(b, jnp.float32)[None, :]
            out = acc
        else:
            acc = acc.astype(ew_dtype)
            if b is not None:
                acc = acc + jnp.asarray(b, jnp.float32).astype(ew_dtype)[None, :]
            if act:
                acc = jnp.where(acc >= 0, acc, LRELU_SLOPE * acc)
            h = acc.astype(jnp.bfloat16)
    return out


# ----------------------------------- main -------------------------------------

if __name__ == "__main__":
    key = jax.random.PRNGKey(0)
    k_param, k_inp = jax.random.split(key)

    conv_params = init_conv_params(k_param)

    # Small input consistent with the module: batch=2, imgch=3, 16x16 spatial.
    # 16 -> 8 (first) -> 4 (main block) -> 1x1 after the final 4x4 conv.
    B, H, W = 2, 16, 16
    inp_a = jax.random.normal(k_inp, (B, IMGCH, H, W), jnp.float32)

    ew_dtype = _elementwise_dtype()
    fused, ref_layers = build_fused_params(conv_params, H, W, ew_dtype)

    (out_src,) = discriminator_forward(fused, inp_a, ew_dtype)
    out_src = jax.block_until_ready(out_src)
    assert out_src.shape == (B, 1), out_src.shape
    assert out_src.dtype == jnp.float32

    # Correctness checks:
    #  (1) conv->matmul folding matches a plain-JAX conv reference (both f32),
    #  (2) the Pallas kernel matches the same bf16/ew_dtype GEMM chain in plain JAX.
    x_flat = inp_a.reshape(B, -1)
    ref_conv = discriminator_forward_ref(conv_params, inp_a)
    chain_f32 = matmul_chain_f32(ref_layers, x_flat)
    chain_bf16 = matmul_chain_bf16(ref_layers, x_flat, ew_dtype)
    np.testing.assert_allclose(np.asarray(chain_f32), np.asarray(ref_conv),
                               rtol=1e-3, atol=1e-3)
    np.testing.assert_allclose(np.asarray(out_src), np.asarray(chain_bf16),
                               rtol=2e-2, atol=2e-2)

    print("KERNEL_OK")
</pallas_src>

<mosaic_0001>
module attributes {stable_mosaic.version = 11 : i64} {
  func.func @kernel(%arg0: i32, %arg1: memref<16x768xf32, #tpu.memory_space<vmem>>, %arg2: memref<768x512xbf16, #tpu.memory_space<vmem>>, %arg3: memref<1x512xbf16, #tpu.memory_space<vmem>>, %arg4: memref<512x256xbf16, #tpu.memory_space<vmem>>, %arg5: memref<256x128xbf16, #tpu.memory_space<vmem>>, %arg6: memref<1x128xf32, #tpu.memory_space<vmem>>, %arg7: memref<16x128xf32, #tpu.memory_space<vmem>>) attributes {dimension_semantics = [#tpu.dimension_semantics<parallel>], iteration_bounds = array<i64: 1>, scalar_prefetch = 0 : i64, scratch_operands = 0 : i64, tpu.core_type = #tpu.core_type<tc>, window_params = [{transform_indices = @transform_0, window_bounds = array<i64: 16, 768>}, {pipeline_mode = #tpu.pipeline_mode<synchronous>, transform_indices = @transform_1, window_bounds = array<i64: 768, 512>}, {pipeline_mode = #tpu.pipeline_mode<synchronous>, transform_indices = @transform_2, window_bounds = array<i64: 1, 512>}, {pipeline_mode = #tpu.pipeline_mode<synchronous>, transform_indices = @transform_3, window_bounds = array<i64: 512, 256>}, {pipeline_mode = #tpu.pipeline_mode<synchronous>, transform_indices = @transform_4, window_bounds = array<i64: 256, 128>}, {pipeline_mode = #tpu.pipeline_mode<synchronous>, transform_indices = @transform_5, window_bounds = array<i64: 1, 128>}, {transform_indices = @transform_6, window_bounds = array<i64: 16, 128>}]} {
    %c0 = arith.constant 0 : index
    %c0_0 = arith.constant 0 : index
    %0 = vector.load %arg1[%c0, %c0_0] : memref<16x768xf32, #tpu.memory_space<vmem>>, vector<16x768xf32>
    %1 = arith.truncf %0 : vector<16x768xf32> to vector<16x768xbf16>
    %c0_1 = arith.constant 0 : index
    %c0_2 = arith.constant 0 : index
    %2 = vector.load %arg2[%c0_1, %c0_2] : memref<768x512xbf16, #tpu.memory_space<vmem>>, vector<768x512xbf16>
    %cst = arith.constant dense<0.000000e+00> : vector<16x512xf32>
    %3 = tpu.matmul %1, %2, %cst {dimension_numbers = #tpu.dot_dimension_numbers<[1], [0], [0], [1], [0, 0, 1, 1], [], []>} : vector<16x768xbf16>, vector<768x512xbf16>, vector<16x512xf32> -> vector<16x512xf32>
    %4 = arith.truncf %3 : vector<16x512xf32> to vector<16x512xbf16>
    %c0_3 = arith.constant 0 : index
    %c0_4 = arith.constant 0 : index
    %5 = vector.load %arg3[%c0_3, %c0_4] : memref<1x512xbf16, #tpu.memory_space<vmem>>, vector<1x512xbf16>
    %6 = vector.broadcast %5 : vector<1x512xbf16> to vector<16x512xbf16>
    %7 = arith.addf %4, %6 : vector<16x512xbf16>
    %cst_5 = arith.constant 0.000000e+00 : bf16
    %8 = vector.broadcast %cst_5 : bf16 to vector<16x512xbf16>
    %9 = arith.cmpf oge, %7, %8 : vector<16x512xbf16>
    %cst_6 = arith.constant 2.001950e-01 : bf16
    %10 = vector.broadcast %cst_6 : bf16 to vector<16x512xbf16>
    %11 = arith.mulf %10, %7 : vector<16x512xbf16>
    %12 = arith.select %9, %7, %11 : vector<16x512xi1>, vector<16x512xbf16>
    %c0_7 = arith.constant 0 : index
    %c0_8 = arith.constant 0 : index
    %13 = vector.load %arg4[%c0_7, %c0_8] : memref<512x256xbf16, #tpu.memory_space<vmem>>, vector<512x256xbf16>
    %cst_9 = arith.constant dense<0.000000e+00> : vector<16x256xf32>
    %14 = tpu.matmul %12, %13, %cst_9 {dimension_numbers = #tpu.dot_dimension_numbers<[1], [0], [0], [1], [0, 0, 1, 1], [], []>} : vector<16x512xbf16>, vector<512x256xbf16>, vector<16x256xf32> -> vector<16x256xf32>
    %15 = arith.truncf %14 : vector<16x256xf32> to vector<16x256xbf16>
    %cst_10 = arith.constant 0.000000e+00 : bf16
    %16 = vector.broadcast %cst_10 : bf16 to vector<16x256xbf16>
    %17 = arith.cmpf oge, %15, %16 : vector<16x256xbf16>
    %cst_11 = arith.constant 2.001950e-01 : bf16
    %18 = vector.broadcast %cst_11 : bf16 to vector<16x256xbf16>
    %19 = arith.mulf %18, %15 : vector<16x256xbf16>
    %20 = arith.select %17, %15, %19 : vector<16x256xi1>, vector<16x256xbf16>
    %c0_12 = arith.constant 0 : index
    %c0_13 = arith.constant 0 : index
    %21 = vector.load %arg5[%c0_12, %c0_13] : memref<256x128xbf16, #tpu.memory_space<vmem>>, vector<256x128xbf16>
    %cst_14 = arith.constant dense<0.000000e+00> : vector<16x128xf32>
    %22 = tpu.matmul %20, %21, %cst_14 {dimension_numbers = #tpu.dot_dimension_numbers<[1], [0], [0], [1], [0, 0, 1, 1], [], []>} : vector<16x256xbf16>, vector<256x128xbf16>, vector<16x128xf32> -> vector<16x128xf32>
    %c0_15 = arith.constant 0 : index
    %c0_16 = arith.constant 0 : index
    %23 = vector.load %arg6[%c0_15, %c0_16] : memref<1x128xf32, #tpu.memory_space<vmem>>, vector<1x128xf32>
    %24 = vector.broadcast %23 : vector<1x128xf32> to vector<16x128xf32>
    %25 = arith.addf %22, %24 : vector<16x128xf32>
    %c0_17 = arith.constant 0 : index
    %c0_18 = arith.constant 0 : index
    %26 = vector.load %arg7[%c0_17, %c0_18] : memref<16x128xf32, #tpu.memory_space<vmem>>, vector<16x128xf32>
    tpu.vector_store %arg7[%c0_17, %c0_18], %25 {strides = array<i32>} : memref<16x128xf32, #tpu.memory_space<vmem>>, vector<16x128xf32>,
    return
  }
  func.func @transform_0(%arg0: i32) -> (i32, i32) {
    %c0_i32 = arith.constant 0 : i32
    %c0_i32_0 = arith.constant 0 : i32
    return %arg0, %c0_i32 : i32, i32
  }
  func.func @transform_1(%arg0: i32) -> (i32, i32) {
    %c0_i32 = arith.constant 0 : i32
    %c0_i32_0 = arith.constant 0 : i32
    %c0_i32_1 = arith.constant 0 : i32
    return %c0_i32, %c0_i32_0 : i32, i32
  }
  func.func @transform_2(%arg0: i32) -> (i32, i32) {
    %c0_i32 = arith.constant 0 : i32
    %c0_i32_0 = arith.constant 0 : i32
    %c0_i32_1 = arith.constant 0 : i32
    return %c0_i32, %c0_i32_0 : i32, i32
  }
  func.func @transform_3(%arg0: i32) -> (i32, i32) {
    %c0_i32 = arith.constant 0 : i32
    %c0_i32_0 = arith.constant 0 : i32
    %c0_i32_1 = arith.constant 0 : i32
    return %c0_i32, %c0_i32_0 : i32, i32
  }
  func.func @transform_4(%arg0: i32) -> (i32, i32) {
    %c0_i32 = arith.constant 0 : i32
    %c0_i32_0 = arith.constant 0 : i32
    %c0_i32_1 = arith.constant 0 : i32
    return %c0_i32, %c0_i32_0 : i32, i32
  }
  func.func @transform_5(%arg0: i32) -> (i32, i32) {
    %c0_i32 = arith.constant 0 : i32
    %c0_i32_0 = arith.constant 0 : i32
    %c0_i32_1 = arith.constant 0 : i32
    return %c0_i32, %c0_i32_0 : i32, i32
  }
  func.func @transform_6(%arg0: i32) -> (i32, i32) {
    %c0_i32 = arith.constant 0 : i32
    %c0_i32_0 = arith.constant 0 : i32
    return %arg0, %c0_i32 : i32, i32
  }
}

</mosaic_0001>

<bundles_post_ra>
// kernel: tpu_custom_call.1
= control target key start
LH: loop header
LB: loop body
LE: loop exit
PB: predicated region body
PF: predicated region fallthrough
CT: control target
= control target key end

     0   :  { %11 = vsyncpa [#allocation3], 0  ;;  %s3205_s0 = inlined_call_operand.hbm [shape: f32[16,768], index: 0, kind: input, shape index: {}]   ;;  %s3206_s1 = inlined_call_operand.hbm [shape: bf16[768,512], index: 1, kind: input, shape index: {}]   ;;  %s3207_s2 = inlined_call_operand.hbm [shape: bf16[1,512], index: 2, kind: input, shape index: {}]   ;;  %s3208_s3 = inlined_call_operand.hbm [shape: bf16[512,256], index: 3, kind: input, shape index: {}]   ;;  %s3209_s4 = inlined_call_operand.hbm [shape: bf16[256,128], index: 4, kind: input, shape index: {}]   ;;  %s3210_s5 = inlined_call_operand.vmem [shape: f32[1,128], index: 5, kind: input, shape index: {}]   ;;  %s3211_s6 = inlined_call_operand.hbm [shape: f32[16,128], index: 6, kind: output, shape index: {}]  }
   0x1   :  { %12 = vsyncpa [#allocation6], 0 }
   0x2   :  { %13 = vsyncpa [#allocation9], 0 }
   0x3   :  { %14 = vsyncpa [#allocation4], 0  ;;  %s3108_s21 = smov [#allocation5]  }
   0x4   :  { %s32_s22 = sshll.u32 %s3108_s21, 4  ;;  %s33_s22 = int_to_ptr.vmem [resolvable:$true] %s32_s22 }
   0x5   :  { %s2988_s23 = scalar_lea.vmem %s33_s22, 24576  ;;  %p2993_p1 = scmp.lt.s32.totalorder %s33_s22, %s33_s22 }
   0x6   :  { %p2989_p0 = scmp.ne.s32.totalorder %s33_s22, %s2988_s23  ;;  %p2994_p2 = scmp.lt.s32.totalorder %s2988_s23, %s2988_s23 }
   0x8   :  { %p2995_p3 = por %p2994_p2, %p2993_p1 }
   0xa   :  { %p2996_p4 = pnand %p2995_p3, %p2989_p0 }
   0xc   :  { %2999 = shalt.err (!%p2996_p4)
}
   0xd   :  { %s3109_s24 = smov 256   ;;  %s3110_s25 = smov 16  }
   0xe   :  { %38 = dma.hbm_to_vmem [thread:$0]  %s3206_s1, 24576, %s33_s22, [#allocation6], %s3109_s24, %s3109_s24, %s3110_s25  }
   0xf   :  { %s3111_s28 = smov [#allocation8]  }
  0x10   :  { %s54_s29 = sshll.u32 %s3111_s28, 4  ;;  %s55_s29 = int_to_ptr.vmem [resolvable:$true] %s54_s29 }
  0x11   :  { %s3008_s30 = scalar_lea.vmem %s55_s29, 8192  ;;  %p3013_p6 = scmp.lt.s32.totalorder %s55_s29, %s55_s29 }
  0x12   :  { %p3009_p5 = scmp.ne.s32.totalorder %s55_s29, %s3008_s30  ;;  %p3014_p7 = scmp.lt.s32.totalorder %s3008_s30, %s3008_s30 }
  0x14   :  { %p3015_p8 = por %p3014_p7, %p3013_p6 }
  0x16   :  { %p3016_p9 = pnand %p3015_p8, %p3009_p5 }
  0x18   :  { %3019 = shalt.err (!%p3016_p9)
}
  0x19   :  { %s3112_s7 = smov 128   ;;  %s3113_s8 = smov 8  }
  0x1a   :  { %60 = dma.hbm_to_vmem [thread:$0]  %s3208_s3, 8192, %s55_s29, [#allocation9], %s3112_s7, %s3112_s7, %s3113_s8  }
  0x1b   :  { %s3114_s1 = smov [#allocation2]  }
  0x1c   :  { %s20_s11 = sshll.u32 %s3114_s1, 4  ;;  %s21_s11 = int_to_ptr.vmem [resolvable:$true] %s20_s11 }
  0x1d   :  { %s3028_s12 = scalar_lea.vmem %s21_s11, 1536  ;;  %p3033_p11 = scmp.lt.s32.totalorder %s21_s11, %s21_s11 }
  0x1e   :  { %p3029_p10 = scmp.ne.s32.totalorder %s21_s11, %s3028_s12  ;;  %p3034_p12 = scmp.lt.s32.totalorder %s3028_s12, %s3028_s12 }
  0x20   :  { %p3035_p13 = por %p3034_p12, %p3033_p11 }
  0x22   :  { %p3036_p0 = pnand %p3035_p13, %p3029_p10 }
  0x24   :  { %3039 = shalt.err (!%p3036_p0)
}
  0x25   :  { %s3115_s13 = smov 768   ;;  %s3116_s14 = smov 48  }
  0x26   :  { %26 = dma.hbm_to_vmem [thread:$0]  %s3205_s0, 1536, %s21_s11, [#allocation3], %s3115_s13, %s3115_s13, %s3116_s14  }
  0x27   :  { %s3117_s17 = smov [#allocation7]   ;;  %s3118_s3 = smov [#allocation10]  }
  0x28   :  { %s45_s18 = sshll.u32 %s3117_s17, 4  ;;  %s66_s19 = sshll.u32 %s3118_s3, 4  ;;  %s46_s18 = int_to_ptr.vmem [resolvable:$true] %s45_s18  ;;  %s67_s19 = int_to_ptr.vmem [resolvable:$true] %s66_s19 }
  0x29   :  { %s3048_s20 = scalar_lea.vmem %s46_s18, 64  ;;  %p3053_p2 = scmp.lt.s32.totalorder %s46_s18, %s46_s18 }
  0x2a   :  { %p3049_p1 = scmp.ne.s32.totalorder %s46_s18, %s3048_s20  ;;  %p3054_p3 = scmp.lt.s32.totalorder %s3048_s20, %s3048_s20 }
  0x2c   :  { %p3055_p4 = por %p3054_p3, %p3053_p2 }
  0x2e   :  { %p3056_p5 = pnand %p3055_p4, %p3049_p1 }
  0x30   :  { %3059 = shalt.err (!%p3056_p5)
}
  0x31   :  { %48 = dma.hbm_to_vmem [thread:$0]  %s3207_s2, 64, %s46_s18, [#allocation6]  }
  0x32   :  { %s3068_s23 = scalar_lea.vmem %s67_s19, 2048  ;;  %p3073_p7 = scmp.lt.s32.totalorder %s67_s19, %s67_s19 }
  0x33   :  { %p3069_p6 = scmp.ne.s32.totalorder %s67_s19, %s3068_s23  ;;  %p3074_p8 = scmp.lt.s32.totalorder %s3068_s23, %s3068_s23 }
  0x35   :  { %p3075_p9 = por %p3074_p8, %p3073_p7 }
  0x37   :  { %p3076_p10 = pnand %p3075_p9, %p3069_p6 }
  0x39   :  { %3079 = shalt.err (!%p3076_p10)
}
  0x3a   :  { %s3119_s0 = smov 64   ;;  %s3120_s24 = smov 4  }
  0x3b   :  { %72 = dma.hbm_to_vmem [thread:$0]  %s3209_s4, 2048, %s67_s19, [#allocation9], %s3119_s0, %s3119_s0, %s3120_s24  }
  0x3c   :  { %3100 = dma.done.wait [#allocation3], 1536  }
  0x3d   :  { %3101 = vsyncadd [#allocation3], 4294965760 }
  0x3e   :  { %3102 = dma.done.wait [#allocation6], 24640  }
  0x3f   :  { %3103 = vsyncadd [#allocation6], 4294942656 }
  0x40   :  { %3104 = dma.done.wait [#allocation9], 10240  }
  0x41   :  { %3105 = vsyncadd [#allocation9], 4294957056  ;;  %v2580_v0 = vld [vmem:[#allocation5 + $0xe4] ss:$16 sps:$4 sm:$0xff]   ;;  %v2584_v2 = vld [vmem:[#allocation5 + $0xe0] ss:$16 sps:$4 sm:$0xff]  }
  0x42   :  { %v2582_v1 = vld [vmem:[#allocation5 + $0x2e4] ss:$16 sps:$4 sm:$0xff]   ;;  %1262 = vmatprep.subr.bf16.mxu0 %v2580_v0  ;;  %v2585_v3 = vld [vmem:[#allocation5 + $0x2e0] ss:$16 sps:$4 sm:$0xff]   ;;  %v93_v46 = vld [vmem:[#allocation2 + $0x8] sm:$0xff]  ;;  %s3122_s27 = smov [#allocation11]  }
  0x43   :  { %1305 = vmatprep.subr.bf16.mxu1 %v2582_v1  ;;  %v2586_v4 = vld [vmem:[#allocation5 + $0xc4] ss:$16 sps:$4 sm:$0xff]   ;;  %1263 = vmatpush1.bf16.msra.mxu0 %v2584_v2  ;;  %v2590_v6 = vld [vmem:[#allocation5 + $0xc0] ss:$16 sps:$4 sm:$0xff]   ;;  %v99_v47 = vld [vmem:[#allocation2 + $0x38] sm:$0xff]  ;;  %s2255_s28 = sshll.u32 %s3122_s27, 4  ;;  %s2256_s28 = int_to_ptr.vmem [resolvable:$true] %s2255_s28 }
  0x44   :  { %1306 = vmatpush1.bf16.msra.mxu1 %v2585_v3  ;;  %v2588_v5 = vld [vmem:[#allocation5 + $0x2c4] ss:$16 sps:$4 sm:$0xff]   ;;  %1264 = vmatprep.subr.bf16.mxu0 %v2586_v4  ;;  %v2591_v7 = vld [vmem:[#allocation5 + $0x2c0] ss:$16 sps:$4 sm:$0xff]   ;;  %v95_v48 = vld [vmem:[#allocation2 + $0x18] sm:$0xff]  ;;  %v105_v53 = vpack.c.bf16 %v99_v47, %v93_v46  ;;  %s3080_s29 = scalar_lea.vmem %s2256_s28, 256  ;;  %p3085_p12 = scmp.lt.s32.totalorder %s2256_s28, %s2256_s28 }
  0x45   :  { %1307 = vmatprep.subr.bf16.mxu1 %v2588_v5  ;;  %v2592_v8 = vld [vmem:[#allocation5 + $0xa4] ss:$16 sps:$4 sm:$0xff]   ;;  %v2596_v10 = vld [vmem:[#allocation5 + $0xa0] ss:$16 sps:$4 sm:$0xff]   ;;  %v101_v49 = vld [vmem:[#allocation2 + $0x48] sm:$0xff]  ;;  %p3081_p11 = scmp.ne.s32.totalorder %s2256_s28, %s3080_s29  ;;  %p3086_p13 = scmp.lt.s32.totalorder %s3080_s29, %s3080_s29 }
  0x46   :  { %v2594_v9 = vld [vmem:[#allocation5 + $0x2a4] ss:$16 sps:$4 sm:$0xff]   ;;  %v2597_v11 = vld [vmem:[#allocation5 + $0x2a0] ss:$16 sps:$4 sm:$0xff]   ;;  %v3176_v54 = vpack.c.bf16 %v101_v49, %v95_v48  ;;  %1294 = vmatprep.mubr.bf16.mxu0 %v105_v53  ;;  %v2721_v46 = vld [vmem:[#allocation5 + $0x8] ss:$16 sps:$4 sm:$0xff]  }
  0x47   :  { %1265 = vmatpush1.bf16.msra.mxu0 %v2590_v6  ;;  %v2598_v12 = vld [vmem:[#allocation5 + $0x84] ss:$16 sps:$4 sm:$0xff]   ;;  %v2602_v14 = vld [vmem:[#allocation5 + $0x80] ss:$16 sps:$4 sm:$0xff]   ;;  %v2729_v48 = vld [vmem:[#allocation5 + $0x1ec] ss:$16 sps:$4 sm:$0xff]   ;;  %p3087_p0 = por %p3086_p13, %p3085_p12 }
  0x48   :  { %1308 = vmatpush1.bf16.msra.mxu1 %v2591_v7  ;;  %1266 = vmatprep.subr.bf16.mxu0 %v2592_v8  ;;  %v2600_v13 = vld [vmem:[#allocation5 + $0x284] ss:$16 sps:$4 sm:$0xff]   ;;  %v2603_v15 = vld [vmem:[#allocation5 + $0x280] ss:$16 sps:$4 sm:$0xff]  }
  0x49   :  { %1309 = vmatprep.subr.bf16.mxu1 %v2594_v9  ;;  %v2604_v16 = vld [vmem:[#allocation5 + $0x64] ss:$16 sps:$4 sm:$0xff]   ;;  %v2608_v18 = vld [vmem:[#allocation5 + $0x60] ss:$16 sps:$4 sm:$0xff]   ;;  %1337 = vmatprep.mubr.bf16.mxu1 %v3176_v54  ;;  %p3088_p1 = pnand %p3087_p0, %p3081_p11 }
  0x4a   :  { %v2606_v17 = vld [vmem:[#allocation5 + $0x264] ss:$16 sps:$4 sm:$0xff]   ;;  %v2609_v19 = vld [vmem:[#allocation5 + $0x260] ss:$16 sps:$4 sm:$0xff]  }
  0x4b   :  { %1267 = vmatpush1.bf16.msra.mxu0 %v2596_v10  ;;  %v2610_v20 = vld [vmem:[#allocation5 + $0x44] ss:$16 sps:$4 sm:$0xff]   ;;  %v2614_v22 = vld [vmem:[#allocation5 + $0x40] ss:$16 sps:$4 sm:$0xff]  }
  0x4c   :  { %1310 = vmatpush1.bf16.msra.mxu1 %v2597_v11  ;;  %1268 = vmatprep.subr.bf16.mxu0 %v2598_v12  ;;  %v2612_v21 = vld [vmem:[#allocation5 + $0x244] ss:$16 sps:$4 sm:$0xff]   ;;  %v2615_v23 = vld [vmem:[#allocation5 + $0x240] ss:$16 sps:$4 sm:$0xff]   ;;  %v2681_v11 = vld [vmem:[#allocation5 + $0xec] ss:$16 sps:$4 sm:$0xff]  }
  0x4d   :  { %1311 = vmatprep.subr.bf16.mxu1 %v2600_v13  ;;  %v2616_v24 = vld [vmem:[#allocation5 + $0x24] ss:$16 sps:$4 sm:$0xff]   ;;  %v2620_v26 = vld [vmem:[#allocation5 + $0x20] ss:$16 sps:$4 sm:$0xff]  }
  0x4e   :  { %v2618_v25 = vld [vmem:[#allocation5 + $0x224] ss:$16 sps:$4 sm:$0xff]   ;;  %v2621_v27 = vld [vmem:[#allocation5 + $0x220] ss:$16 sps:$4 sm:$0xff]  }
  0x4f   :  { %1269 = vmatpush1.bf16.msra.mxu0 %v2602_v14  ;;  %v2622_v28 = vld [vmem:[#allocation5 + $0x4] ss:$16 sps:$4 sm:$0xff]   ;;  %v2626_v30 = vld [vmem:[#allocation5] ss:$16 sps:$4 sm:$0xff]  }
  0x50   :  { %1312 = vmatpush1.bf16.msra.mxu1 %v2603_v15  ;;  %1270 = vmatprep.subr.bf16.mxu0 %v2604_v16  ;;  %v2624_v29 = vld [vmem:[#allocation5 + $0x204] ss:$16 sps:$4 sm:$0xff]   ;;  %v2627_v31 = vld [vmem:[#allocation5 + $0x200] ss:$16 sps:$4 sm:$0xff]   ;;  %v2679_v15 = vld [vmem:[#allocation5 + $0xe8] ss:$16 sps:$4 sm:$0xff]  }
  0x51   :  { %1313 = vmatprep.subr.bf16.mxu1 %v2606_v17  ;;  %v2628_v32 = vld [vmem:[#allocation5 + $0x1e4] ss:$16 sps:$4 sm:$0xff]   ;;  %v2632_v34 = vld [vmem:[#allocation5 + $0x1e0] ss:$16 sps:$4 sm:$0xff]   ;;  %v2687_v17 = vld [vmem:[#allocation5 + $0xcc] ss:$16 sps:$4 sm:$0xff]  }
  0x52   :  { %v2630_v33 = vld [vmem:[#allocation5 + $0x3e4] ss:$16 sps:$4 sm:$0xff]   ;;  %v2633_v35 = vld [vmem:[#allocation5 + $0x3e0] ss:$16 sps:$4 sm:$0xff]  }
  0x53   :  { %1271 = vmatpush1.bf16.msra.mxu0 %v2608_v18  ;;  %v2634_v36 = vld [vmem:[#allocation5 + $0x1c4] ss:$16 sps:$4 sm:$0xff]   ;;  %v2638_v38 = vld [vmem:[#allocation5 + $0x1c0] ss:$16 sps:$4 sm:$0xff]  }
  0x54   :  { %1314 = vmatpush1.bf16.msra.mxu1 %v2609_v19  ;;  %1272 = vmatprep.subr.bf16.mxu0 %v2610_v20  ;;  %v2636_v37 = vld [vmem:[#allocation5 + $0x3c4] ss:$16 sps:$4 sm:$0xff]   ;;  %v2639_v39 = vld [vmem:[#allocation5 + $0x3c0] ss:$16 sps:$4 sm:$0xff]   ;;  %v2685_v19 = vld [vmem:[#allocation5 + $0xc8] ss:$16 sps:$4 sm:$0xff]  }
  0x55   :  { %1315 = vmatprep.subr.bf16.mxu1 %v2612_v21  ;;  %v2640_v40 = vld [vmem:[#allocation5 + $0x1a4] ss:$16 sps:$4 sm:$0xff]   ;;  %v2644_v42 = vld [vmem:[#allocation5 + $0x1a0] ss:$16 sps:$4 sm:$0xff]   ;;  %v2693_v21 = vld [vmem:[#allocation5 + $0xac] ss:$16 sps:$4 sm:$0xff]  }
  0x56   :  { %v2642_v41 = vld [vmem:[#allocation5 + $0x3a4] ss:$16 sps:$4 sm:$0xff]   ;;  %v2645_v43 = vld [vmem:[#allocation5 + $0x3a0] ss:$16 sps:$4 sm:$0xff]  }
  0x57   :  { %1273 = vmatpush1.bf16.msra.mxu0 %v2614_v22  ;;  %v2646_v44 = vld [vmem:[#allocation5 + $0x184] ss:$16 sps:$4 sm:$0xff]   ;;  %v2650_v50 = vld [vmem:[#allocation5 + $0x180] ss:$16 sps:$4 sm:$0xff]  }
  0x58   :  { %1316 = vmatpush1.bf16.msra.mxu1 %v2615_v23  ;;  %1274 = vmatprep.subr.bf16.mxu0 %v2616_v24  ;;  %v2648_v45 = vld [vmem:[#allocation5 + $0x384] ss:$16 sps:$4 sm:$0xff]   ;;  %v2651_v51 = vld [vmem:[#allocation5 + $0x380] ss:$16 sps:$4 sm:$0xff]   ;;  %v2691_v23 = vld [vmem:[#allocation5 + $0xa8] ss:$16 sps:$4 sm:$0xff]  }
  0x59   :  { %1317 = vmatprep.subr.bf16.mxu1 %v2618_v25  ;;  %v2652_v52 = vld [vmem:[#allocation5 + $0x164] ss:$16 sps:$4 sm:$0xff]   ;;  %v2656_v56 = vld [vmem:[#allocation5 + $0x160] ss:$16 sps:$4 sm:$0xff]   ;;  %v2699_v25 = vld [vmem:[#allocation5 + $0x8c] ss:$16 sps:$4 sm:$0xff]  }
  0x5a   :  { %v2654_v55 = vld [vmem:[#allocation5 + $0x364] ss:$16 sps:$4 sm:$0xff]   ;;  %v2657_v57 = vld [vmem:[#allocation5 + $0x360] ss:$16 sps:$4 sm:$0xff]  }
  0x5b   :  { %1275 = vmatpush1.bf16.msra.mxu0 %v2620_v26  ;;  %v2658_v58 = vld [vmem:[#allocation5 + $0x144] ss:$16 sps:$4 sm:$0xff]   ;;  %v2662_v60 = vld [vmem:[#allocation5 + $0x140] ss:$16 sps:$4 sm:$0xff]  }
  0x5c   :  { %1318 = vmatpush1.bf16.msra.mxu1 %v2621_v27  ;;  %1276 = vmatprep.subr.bf16.mxu0 %v2622_v28  ;;  %v2660_v59 = vld [vmem:[#allocation5 + $0x344] ss:$16 sps:$4 sm:$0xff]   ;;  %v2663_v61 = vld [vmem:[#allocation5 + $0x340] ss:$16 sps:$4 sm:$0xff]   ;;  %v2697_v27 = vld [vmem:[#allocation5 + $0x88] ss:$16 sps:$4 sm:$0xff]  }
  0x5d   :  { %1319 = vmatprep.subr.bf16.mxu1 %v2624_v29  ;;  %v2664_v62 = vld [vmem:[#allocation5 + $0x124] ss:$16 sps:$4 sm:$0xff]   ;;  %v2668_v0 = vld [vmem:[#allocation5 + $0x120] ss:$16 sps:$4 sm:$0xff]   ;;  %v2705_v29 = vld [vmem:[#allocation5 + $0x6c] ss:$16 sps:$4 sm:$0xff]  }
  0x5e   :  { %v2666_v63 = vld [vmem:[#allocation5 + $0x324] ss:$16 sps:$4 sm:$0xff]   ;;  %v2669_v1 = vld [vmem:[#allocation5 + $0x320] ss:$16 sps:$4 sm:$0xff]  }
  0x5f   :  { %1277 = vmatpush1.bf16.msra.mxu0 %v2626_v30  ;;  %v2670_v2 = vld [vmem:[#allocation5 + $0x104] ss:$16 sps:$4 sm:$0xff]   ;;  %v2674_v4 = vld [vmem:[#allocation5 + $0x100] ss:$16 sps:$4 sm:$0xff]  }
  0x60   :  { %1320 = vmatpush1.bf16.msra.mxu1 %v2627_v31  ;;  %1278 = vmatprep.subr.bf16.mxu0 %v2628_v32  ;;  %v2672_v3 = vld [vmem:[#allocation5 + $0x304] ss:$16 sps:$4 sm:$0xff]   ;;  %v2675_v5 = vld [vmem:[#allocation5 + $0x300] ss:$16 sps:$4 sm:$0xff]   ;;  %v2703_v31 = vld [vmem:[#allocation5 + $0x68] ss:$16 sps:$4 sm:$0xff]  }
  0x61   :  { %1321 = vmatprep.subr.bf16.mxu1 %v2630_v33  ;;  %v92_v6 = vld [vmem:[#allocation2] sm:$0xff]  ;;  %v98_v7 = vld [vmem:[#allocation2 + $0x30] sm:$0xff]  ;;  %v2711_v33 = vld [vmem:[#allocation5 + $0x4c] ss:$16 sps:$4 sm:$0xff]  }
  0x62   :  { %v94_v8 = vld [vmem:[#allocation2 + $0x10] sm:$0xff]  ;;  %v100_v9 = vld [vmem:[#allocation2 + $0x40] sm:$0xff]  ;;  %v3179_v12 = vpack.c.bf16 %v98_v7, %v92_v6  ;;  %v2757_v7 = vld [vmem:[#allocation5 + $0x148] ss:$16 sps:$4 sm:$0xff]  }
  0x63   :  { %1279 = vmatpush2.bf16.msra.mxu0 %v2632_v34  ;;  %v2678_v10 = vld [vmem:[#allocation5 + $0x4e4] ss:$16 sps:$4 sm:$0xff]   ;;  %v3181_v13 = vpack.c.bf16 %v100_v9, %v94_v8  ;;  %v2676_v14 = vld [vmem:[#allocation5 + $0x4e0] ss:$16 sps:$4 sm:$0xff]   ;;  %v2765_v9 = vld [vmem:[#allocation5 + $0x12c] ss:$16 sps:$4 sm:$0xff]  }
  0x64   :  { %1322 = vmatpush2.bf16.msra.mxu1 %v2633_v35  ;;  %1280 = vmatprep.subr.bf16.mxu0 %v2634_v36  ;;  %v2684_v16 = vld [vmem:[#allocation5 + $0x4c4] ss:$16 sps:$4 sm:$0xff]   ;;  %v2682_v18 = vld [vmem:[#allocation5 + $0x4c0] ss:$16 sps:$4 sm:$0xff]   ;;  %v2709_v35 = vld [vmem:[#allocation5 + $0x48] ss:$16 sps:$4 sm:$0xff]  }
  0x65   :  { %1323 = vmatprep.subr.bf16.mxu1 %v2636_v37  ;;  %v2690_v20 = vld [vmem:[#allocation5 + $0x4a4] ss:$16 sps:$4 sm:$0xff]   ;;  %v2688_v22 = vld [vmem:[#allocation5 + $0x4a0] ss:$16 sps:$4 sm:$0xff]   ;;  %v2717_v37 = vld [vmem:[#allocation5 + $0x2c] ss:$16 sps:$4 sm:$0xff]  }
  0x66   :  { %v2696_v24 = vld [vmem:[#allocation5 + $0x484] ss:$16 sps:$4 sm:$0xff]   ;;  %v2694_v26 = vld [vmem:[#allocation5 + $0x480] ss:$16 sps:$4 sm:$0xff]  }
  0x67   :  { %1281 = vmatpush2.bf16.msra.mxu0 %v2638_v38  ;;  %v2702_v28 = vld [vmem:[#allocation5 + $0x464] ss:$16 sps:$4 sm:$0xff]   ;;  %v2700_v30 = vld [vmem:[#allocation5 + $0x460] ss:$16 sps:$4 sm:$0xff]  }
  0x68   :  { %1324 = vmatpush2.bf16.msra.mxu1 %v2639_v39  ;;  %1282 = vmatprep.subr.bf16.mxu0 %v2640_v40  ;;  %v2708_v32 = vld [vmem:[#allocation5 + $0x444] ss:$16 sps:$4 sm:$0xff]   ;;  %v2706_v34 = vld [vmem:[#allocation5 + $0x440] ss:$16 sps:$4 sm:$0xff]   ;;  %v2715_v39 = vld [vmem:[#allocation5 + $0x28] ss:$16 sps:$4 sm:$0xff]  }
  0x69   :  { %1325 = vmatprep.subr.bf16.mxu1 %v2642_v41  ;;  %v2714_v36 = vld [vmem:[#allocation5 + $0x424] ss:$16 sps:$4 sm:$0xff]   ;;  %v2712_v38 = vld [vmem:[#allocation5 + $0x420] ss:$16 sps:$4 sm:$0xff]   ;;  %v97_v41 = vld [vmem:[#allocation2 + $0x28] sm:$0xff] }
  0x6a   :  { %v2720_v40 = vld [vmem:[#allocation5 + $0x404] ss:$16 sps:$4 sm:$0xff]   ;;  %v2724_v49 = vld [vmem:[#allocation5 + $0x5e0] ss:$16 sps:$4 sm:$0xff]  }
  0x6b   :  { %1283 = vmatpush2.bf16.msra.mxu0 %v2644_v42  ;;  %v103_v42 = vld [vmem:[#allocation2 + $0x58] sm:$0xff]  ;;  %v2726_v47 = vld [vmem:[#allocation5 + $0x5e4] ss:$16 sps:$4 sm:$0xff]   ;;  %v2754_v6 = vld [vmem:[#allocation5 + $0x540] ss:$16 sps:$4 sm:$0xff]  }
  0x6c   :  { %1326 = vmatpush2.bf16.msra.mxu1 %v2645_v43  ;;  %1284 = vmatprep.subr.bf16.mxu0 %v2646_v44  ;;  %v2723_v43 = vld [vmem:[#allocation5 + $0xc] ss:$16 sps:$4 sm:$0xff]   ;;  %v3185_v44 = vpack.c.bf16 %v103_v42, %v97_v41  ;;  %v2762_v8 = vld [vmem:[#allocation5 + $0x524] ss:$16 sps:$4 sm:$0xff]   ;;  %v2802_v41 = vld [vmem:[#allocation5 + $0x248] ss:$16 sps:$4 sm:$0xff]  }
  0x6d   :  { %1327 = vmatprep.subr.bf16.mxu1 %v2648_v45  ;;  %v2718_v45 = vld [vmem:[#allocation5 + $0x400] ss:$16 sps:$4 sm:$0xff]   ;;  %v2805_v42 = vld [vmem:[#allocation5 + $0x448] ss:$16 sps:$4 sm:$0xff]  }
  0x6f   :  { %1285 = vmatpush2.bf16.msra.mxu0 %v2650_v50  ;;  %v2727_v50 = vld [vmem:[#allocation5 + $0x1e8] ss:$16 sps:$4 sm:$0xff]  }
  0x70   :  { %1328 = vmatpush2.bf16.msra.mxu1 %v2651_v51  ;;  %1286 = vmatprep.subr.bf16.mxu0 %v2652_v52  ;;  %v2732_v51 = vld [vmem:[#allocation5 + $0x5c4] ss:$16 sps:$4 sm:$0xff]   ;;  %v2735_v52 = vld [vmem:[#allocation5 + $0x1cc] ss:$16 sps:$4 sm:$0xff]  }
  0x71   :  { %1329 = vmatprep.subr.bf16.mxu1 %v2654_v55  ;;  %v2733_v55 = vld [vmem:[#allocation5 + $0x1c8] ss:$16 sps:$4 sm:$0xff]  }
  0x73   :  { %1287 = vmatpush2.bf16.msra.mxu0 %v2656_v56  ;;  %v2738_v56 = vld [vmem:[#allocation5 + $0x5a4] ss:$16 sps:$4 sm:$0xff]  }
  0x74   :  { %1330 = vmatpush2.bf16.msra.mxu1 %v2657_v57  ;;  %1288 = vmatprep.subr.bf16.mxu0 %v2658_v58  ;;  %v2741_v57 = vld [vmem:[#allocation5 + $0x1ac] ss:$16 sps:$4 sm:$0xff]   ;;  %v2736_v58 = vld [vmem:[#allocation5 + $0x5a0] ss:$16 sps:$4 sm:$0xff]  }
  0x75   :  { %1331 = vmatprep.subr.bf16.mxu1 %v2660_v59  ;;  %v2739_v59 = vld [vmem:[#allocation5 + $0x1a8] ss:$16 sps:$4 sm:$0xff]  }
  0x77   :  { %1289 = vmatpush2.bf16.msra.mxu0 %v2662_v60  ;;  %v2744_v60 = vld [vmem:[#allocation5 + $0x584] ss:$16 sps:$4 sm:$0xff]  }
  0x78   :  { %1332 = vmatpush2.bf16.msra.mxu1 %v2663_v61  ;;  %1290 = vmatprep.subr.bf16.mxu0 %v2664_v62  ;;  %v2747_v61 = vld [vmem:[#allocation5 + $0x18c] ss:$16 sps:$4 sm:$0xff]   ;;  %v2742_v62 = vld [vmem:[#allocation5 + $0x580] ss:$16 sps:$4 sm:$0xff]  }
  0x79   :  { %1333 = vmatprep.subr.bf16.mxu1 %v2666_v63  ;;  %v2745_v63 = vld [vmem:[#allocation5 + $0x188] ss:$16 sps:$4 sm:$0xff]  }
  0x7b   :  { %1291 = vmatpush2.bf16.msra.mxu0 %v2668_v0  ;;  %v2750_v0 = vld [vmem:[#allocation5 + $0x564] ss:$16 sps:$4 sm:$0xff]  }
  0x7c   :  { %1334 = vmatpush2.bf16.msra.mxu1 %v2669_v1  ;;  %1292 = vmatprep.subr.bf16.mxu0 %v2670_v2  ;;  %v2753_v1 = vld [vmem:[#allocation5 + $0x16c] ss:$16 sps:$4 sm:$0xff]   ;;  %v2748_v2 = vld [vmem:[#allocation5 + $0x560] ss:$16 sps:$4 sm:$0xff]  }
  0x7d   :  { %1335 = vmatprep.subr.bf16.mxu1 %v2672_v3  ;;  %v2751_v3 = vld [vmem:[#allocation5 + $0x168] ss:$16 sps:$4 sm:$0xff]  }
  0x7f   :  { %1293 = vmatpush2.bf16.msra.mxu0 %v2674_v4  ;;  %v2756_v4 = vld [vmem:[#allocation5 + $0x544] ss:$16 sps:$4 sm:$0xff]  }
  0x80   :  { %1336 = vmatpush2.bf16.msra.mxu1 %v2675_v5  ;;  %1348 = vmatprep.subr.bf16.mxu0 %v2678_v10  ;;  %v2759_v5 = vld [vmem:[#allocation5 + $0x14c] ss:$16 sps:$4 sm:$0xff]   ;;  %v2760_v10 = vld [vmem:[#allocation5 + $0x520] ss:$16 sps:$4 sm:$0xff]  }
  0x81   :  { %1391 = vmatprep.subr.bf16.mxu1 %v2681_v11  ;;  %v2763_v11 = vld [vmem:[#allocation5 + $0x128] ss:$16 sps:$4 sm:$0xff]  }
  0x82   :  { %1295 = vmatmul.mubr.bf16.vlgmr.msra.gmra.mxu0 %v3179_v12 }
  0x83   :  { %1338 = vmatmul.mubr.bf16.vlgmr.msra.gmra.mxu1 %v3181_v13  ;;  %1349 = vmatpush1.bf16.msra.mxu0 %v2676_v14  ;;  %v2768_v14 = vld [vmem:[#allocation5 + $0x504] ss:$16 sps:$4 sm:$0xff]  }
  0x84   :  { %1392 = vmatpush1.bf16.msra.mxu1 %v2679_v15  ;;  %1350 = vmatprep.subr.bf16.mxu0 %v2684_v16  ;;  %v2771_v15 = vld [vmem:[#allocation5 + $0x10c] ss:$16 sps:$4 sm:$0xff]   ;;  %v2766_v16 = vld [vmem:[#allocation5 + $0x500] ss:$16 sps:$4 sm:$0xff]  }
  0x85   :  { %1393 = vmatprep.subr.bf16.mxu1 %v2687_v17  ;;  %1423 = vmatprep.mubr.bf16.mxu1 %v105_v53  ;;  %v2730_v53 = vld [vmem:[#allocation5 + $0x5c0] ss:$16 sps:$4 sm:$0xff]   ;;  %v2769_v17 = vld [vmem:[#allocation5 + $0x108] ss:$16 sps:$4 sm:$0xff]  }
  0x86   :  { %1380 = vmatprep.mubr.bf16.mxu0 %v3185_v44 }
  0x87   :  { %1351 = vmatpush1.bf16.msra.mxu0 %v2682_v18  ;;  %v96_v18 = vld [vmem:[#allocation2 + $0x20] sm:$0xff] }
  0x88   :  { %1394 = vmatpush1.bf16.msra.mxu1 %v2685_v19  ;;  %1352 = vmatprep.subr.bf16.mxu0 %v2690_v20  ;;  %v102_v19 = vld [vmem:[#allocation2 + $0x50] sm:$0xff]  ;;  %v2774_v20 = vld [vmem:[#allocation5 + $0x2ec] ss:$16 sps:$4 sm:$0xff]  }
  0x89   :  { %1395 = vmatprep.subr.bf16.mxu1 %v2693_v21  ;;  %v2777_v21 = vld [vmem:[#allocation5 + $0x4ec] ss:$16 sps:$4 sm:$0xff]  }
  0x8b   :  { %1353 = vmatpush1.bf16.msra.mxu0 %v2688_v22  ;;  %v3188_v22 = vpack.c.bf16 %v102_v19, %v96_v18  ;;  %v2864_v18 = vld [vmem:[#allocation5 + $0x30c] ss:$16 sps:$4 sm:$0xff]  }
  0x8c   :  { %1396 = vmatpush1.bf16.msra.mxu1 %v2691_v23  ;;  %1354 = vmatprep.subr.bf16.mxu0 %v2696_v24  ;;  %v2772_v23 = vld [vmem:[#allocation5 + $0x2e8] ss:$16 sps:$4 sm:$0xff]   ;;  %v2867_v19 = vld [vmem:[#allocation5 + $0x50c] ss:$16 sps:$4 sm:$0xff]  }
  0x8d   :  { %1397 = vmatprep.subr.bf16.mxu1 %v2699_v25  ;;  %v2775_v24 = vld [vmem:[#allocation5 + $0x4e8] ss:$16 sps:$4 sm:$0xff]   ;;  %v2780_v25 = vld [vmem:[#allocation5 + $0x2cc] ss:$16 sps:$4 sm:$0xff]  }
  0x8f   :  { %1355 = vmatpush1.bf16.msra.mxu0 %v2694_v26  ;;  %v2783_v26 = vld [vmem:[#allocation5 + $0x4cc] ss:$16 sps:$4 sm:$0xff]  }
  0x90   :  { %1398 = vmatpush1.bf16.msra.mxu1 %v2697_v27  ;;  %1356 = vmatprep.subr.bf16.mxu0 %v2702_v28  ;;  %v2778_v27 = vld [vmem:[#allocation5 + $0x2c8] ss:$16 sps:$4 sm:$0xff]  }
  0x91   :  { %1399 = vmatprep.subr.bf16.mxu1 %v2705_v29  ;;  %v2781_v28 = vld [vmem:[#allocation5 + $0x4c8] ss:$16 sps:$4 sm:$0xff]   ;;  %v2786_v29 = vld [vmem:[#allocation5 + $0x2ac] ss:$16 sps:$4 sm:$0xff]  }
  0x93   :  { %1357 = vmatpush1.bf16.msra.mxu0 %v2700_v30  ;;  %v2789_v30 = vld [vmem:[#allocation5 + $0x4ac] ss:$16 sps:$4 sm:$0xff]  }
  0x94   :  { %1400 = vmatpush1.bf16.msra.mxu1 %v2703_v31  ;;  %1358 = vmatprep.subr.bf16.mxu0 %v2708_v32  ;;  %v2784_v31 = vld [vmem:[#allocation5 + $0x2a8] ss:$16 sps:$4 sm:$0xff]  }
  0x95   :  { %1401 = vmatprep.subr.bf16.mxu1 %v2711_v33  ;;  %v2787_v32 = vld [vmem:[#allocation5 + $0x4a8] ss:$16 sps:$4 sm:$0xff]   ;;  %v2792_v33 = vld [vmem:[#allocation5 + $0x28c] ss:$16 sps:$4 sm:$0xff]  }
  0x97   :  { %1359 = vmatpush1.bf16.msra.mxu0 %v2706_v34  ;;  %v2795_v34 = vld [vmem:[#allocation5 + $0x48c] ss:$16 sps:$4 sm:$0xff]  }
  0x98   :  { %1402 = vmatpush1.bf16.msra.mxu1 %v2709_v35  ;;  %1360 = vmatprep.subr.bf16.mxu0 %v2714_v36  ;;  %v2793_v35 = vld [vmem:[#allocation5 + $0x488] ss:$16 sps:$4 sm:$0xff]   ;;  %v2798_v36 = vld [vmem:[#allocation5 + $0x26c] ss:$16 sps:$4 sm:$0xff]  }
  0x99   :  { %1403 = vmatprep.subr.bf16.mxu1 %v2717_v37  ;;  %v2801_v37 = vld [vmem:[#allocation5 + $0x46c] ss:$16 sps:$4 sm:$0xff]  }
  0x9b   :  { %1361 = vmatpush1.bf16.msra.mxu0 %v2712_v38  ;;  %v2796_v38 = vld [vmem:[#allocation5 + $0x268] ss:$16 sps:$4 sm:$0xff]  }
  0x9c   :  { %1404 = vmatpush1.bf16.msra.mxu1 %v2715_v39  ;;  %1362 = vmatprep.subr.bf16.mxu0 %v2720_v40  ;;  %v2799_v39 = vld [vmem:[#allocation5 + $0x468] ss:$16 sps:$4 sm:$0xff]   ;;  %v2807_v40 = vld [vmem:[#allocation5 + $0x44c] ss:$16 sps:$4 sm:$0xff]  }
  0x9d   :  { %1405 = vmatprep.subr.bf16.mxu1 %v2723_v43  ;;  %v2810_v43 = vld [vmem:[#allocation5 + $0x22c] ss:$16 sps:$4 sm:$0xff]  }
  0x9f   :  { %1363 = vmatpush1.bf16.msra.mxu0 %v2718_v45  ;;  %v2808_v45 = vld [vmem:[#allocation5 + $0x228] ss:$16 sps:$4 sm:$0xff]  }
  0xa0   :  { %1406 = vmatpush1.bf16.msra.mxu1 %v2721_v46  ;;  %1364 = vmatprep.subr.bf16.mxu0 %v2726_v47  ;;  %v2811_v46 = vld [vmem:[#allocation5 + $0x428] ss:$16 sps:$4 sm:$0xff]   ;;  %v2816_v47 = vld [vmem:[#allocation5 + $0x20c] ss:$16 sps:$4 sm:$0xff]  }
  0xa1   :  { %1407 = vmatprep.subr.bf16.mxu1 %v2729_v48  ;;  %v2819_v48 = vld [vmem:[#allocation5 + $0x40c] ss:$16 sps:$4 sm:$0xff]  }
  0xa3   :  { %1365 = vmatpush2.bf16.msra.mxu0 %v2724_v49  ;;  %v2814_v49 = vld [vmem:[#allocation5 + $0x208] ss:$16 sps:$4 sm:$0xff]  }
  0xa4   :  { %1408 = vmatpush2.bf16.msra.mxu1 %v2727_v50  ;;  %1366 = vmatprep.subr.bf16.mxu0 %v2732_v51  ;;  %v2817_v50 = vld [vmem:[#allocation5 + $0x408] ss:$16 sps:$4 sm:$0xff]   ;;  %v2822_v51 = vld [vmem:[#allocation5 + $0x3ec] ss:$16 sps:$4 sm:$0xff]  }
  0xa5   :  { %1409 = vmatprep.subr.bf16.mxu1 %v2735_v52  ;;  %v2825_v52 = vld [vmem:[#allocation5 + $0x5ec] ss:$16 sps:$4 sm:$0xff]  }
  0xa7   :  { %1367 = vmatpush2.bf16.msra.mxu0 %v2730_v53  ;;  %v2820_v53 = vld [vmem:[#allocation5 + $0x3e8] ss:$16 sps:$4 sm:$0xff]  }
  0xa8   :  { %1410 = vmatpush2.bf16.msra.mxu1 %v2733_v55  ;;  %1368 = vmatprep.subr.bf16.mxu0 %v2738_v56  ;;  %v2823_v55 = vld [vmem:[#allocation5 + $0x5e8] ss:$16 sps:$4 sm:$0xff]   ;;  %v2828_v56 = vld [vmem:[#allocation5 + $0x3cc] ss:$16 sps:$4 sm:$0xff]  }
  0xa9   :  { %1411 = vmatprep.subr.bf16.mxu1 %v2741_v57  ;;  %v2831_v57 = vld [vmem:[#allocation5 + $0x5cc] ss:$16 sps:$4 sm:$0xff]  }
  0xab   :  { %1369 = vmatpush2.bf16.msra.mxu0 %v2736_v58  ;;  %v2826_v58 = vld [vmem:[#allocation5 + $0x3c8] ss:$16 sps:$4 sm:$0xff]  }
  0xac   :  { %1412 = vmatpush2.bf16.msra.mxu1 %v2739_v59  ;;  %1370 = vmatprep.subr.bf16.mxu0 %v2744_v60  ;;  %v2829_v59 = vld [vmem:[#allocation5 + $0x5c8] ss:$16 sps:$4 sm:$0xff]   ;;  %v2834_v60 = vld [vmem:[#allocation5 + $0x3ac] ss:$16 sps:$4 sm:$0xff]  }
  0xad   :  { %1413 = vmatprep.subr.bf16.mxu1 %v2747_v61  ;;  %v2837_v61 = vld [vmem:[#allocation5 + $0x5ac] ss:$16 sps:$4 sm:$0xff]  }
  0xaf   :  { %1371 = vmatpush2.bf16.msra.mxu0 %v2742_v62  ;;  %v2832_v62 = vld [vmem:[#allocation5 + $0x3a8] ss:$16 sps:$4 sm:$0xff]  }
  0xb0   :  { %1414 = vmatpush2.bf16.msra.mxu1 %v2745_v63  ;;  %1372 = vmatprep.subr.bf16.mxu0 %v2750_v0  ;;  %v2835_v63 = vld [vmem:[#allocation5 + $0x5a8] ss:$16 sps:$4 sm:$0xff]   ;;  %v2840_v0 = vld [vmem:[#allocation5 + $0x38c] ss:$16 sps:$4 sm:$0xff]  }
  0xb1   :  { %1415 = vmatprep.subr.bf16.mxu1 %v2753_v1  ;;  %v2843_v1 = vld [vmem:[#allocation5 + $0x58c] ss:$16 sps:$4 sm:$0xff]  }
  0xb3   :  { %1373 = vmatpush2.bf16.msra.mxu0 %v2748_v2  ;;  %v2838_v2 = vld [vmem:[#allocation5 + $0x388] ss:$16 sps:$4 sm:$0xff]  }
  0xb4   :  { %1416 = vmatpush2.bf16.msra.mxu1 %v2751_v3  ;;  %1374 = vmatprep.subr.bf16.mxu0 %v2756_v4  ;;  %v2841_v3 = vld [vmem:[#allocation5 + $0x588] ss:$16 sps:$4 sm:$0xff]   ;;  %v2846_v4 = vld [vmem:[#allocation5 + $0x36c] ss:$16 sps:$4 sm:$0xff]  }
  0xb5   :  { %1417 = vmatprep.subr.bf16.mxu1 %v2759_v5  ;;  %v2849_v5 = vld [vmem:[#allocation5 + $0x56c] ss:$16 sps:$4 sm:$0xff]  }
  0xb7   :  { %1375 = vmatpush2.bf16.msra.mxu0 %v2754_v6  ;;  %v2844_v6 = vld [vmem:[#allocation5 + $0x368] ss:$16 sps:$4 sm:$0xff]  }
  0xb8   :  { %1418 = vmatpush2.bf16.msra.mxu1 %v2757_v7  ;;  %1376 = vmatprep.subr.bf16.mxu0 %v2762_v8  ;;  %v2847_v7 = vld [vmem:[#allocation5 + $0x568] ss:$16 sps:$4 sm:$0xff]   ;;  %v2852_v8 = vld [vmem:[#allocation5 + $0x34c] ss:$16 sps:$4 sm:$0xff]  }
  0xb9   :  { %1419 = vmatprep.subr.bf16.mxu1 %v2765_v9  ;;  %v2855_v9 = vld [vmem:[#allocation5 + $0x54c] ss:$16 sps:$4 sm:$0xff]  }
  0xbb   :  { %1377 = vmatpush2.bf16.msra.mxu0 %v2760_v10  ;;  %v2850_v10 = vld [vmem:[#allocation5 + $0x348] ss:$16 sps:$4 sm:$0xff]  }
  0xbc   :  { %1420 = vmatpush2.bf16.msra.mxu1 %v2763_v11  ;;  %1378 = vmatprep.subr.bf16.mxu0 %v2768_v14  ;;  %v2853_v11 = vld [vmem:[#allocation5 + $0x548] ss:$16 sps:$4 sm:$0xff]   ;;  %v2858_v14 = vld [vmem:[#allocation5 + $0x32c] ss:$16 sps:$4 sm:$0xff]  }
  0xbd   :  { %1421 = vmatprep.subr.bf16.mxu1 %v2771_v15  ;;  %v2861_v15 = vld [vmem:[#allocation5 + $0x52c] ss:$16 sps:$4 sm:$0xff]  }
  0xbf   :  { %1379 = vmatpush2.bf16.msra.mxu0 %v2766_v16  ;;  %v2856_v16 = vld [vmem:[#allocation5 + $0x328] ss:$16 sps:$4 sm:$0xff]  }
  0xc0   :  { %1422 = vmatpush2.bf16.msra.mxu1 %v2769_v17  ;;  %1434 = vmatprep.subr.bf16.mxu0 %v2774_v20  ;;  %v2859_v17 = vld [vmem:[#allocation5 + $0x528] ss:$16 sps:$4 sm:$0xff]  }
  0xc1   :  { %1477 = vmatprep.subr.bf16.mxu1 %v2777_v21  ;;  %v2862_v20 = vld [vmem:[#allocation5 + $0x308] ss:$16 sps:$4 sm:$0xff]  }
  0xc2   :  { %1381 = vmatmul.mubr.bf16.vlgmr.msra.gmra.mxu0 %v3188_v22  ;;  %v2865_v21 = vld [vmem:[#allocation5 + $0x508] ss:$16 sps:$4 sm:$0xff]  }
  0xc3   :  { %1424 = vmatmul.mubr.bf16.vlgmr.msra.gmra.mxu1 %v3179_v12  ;;  %1435 = vmatpush1.bf16.msra.mxu0 %v2772_v23  ;;  %v2790_v12 = vld [vmem:[#allocation5 + $0x288] ss:$16 sps:$4 sm:$0xff]  }
  0xc4   :  { %1478 = vmatpush1.bf16.msra.mxu1 %v2775_v24  ;;  %1436 = vmatprep.subr.bf16.mxu0 %v2780_v25  ;;  %v2870_v23 = vld [vmem:[#allocation8 + $0x74] ss:$8 sps:$4 sm:$0xff]   ;;  %v2868_v24 = vld [vmem:[#allocation8 + $0x70] ss:$8 sps:$4 sm:$0xff]   ;;  %v2873_v25 = vld [vmem:[#allocation8 + $0x64] ss:$8 sps:$4 sm:$0xff]  }
  0xc5   :  { %1479 = vmatprep.subr.bf16.mxu1 %v2783_v26  ;;  %1466 = vmatprep.mubr.bf16.mxu0 %v3176_v54  ;;  %v2804_v54 = vld [vmem:[#allocation5 + $0x24c] ss:$16 sps:$4 sm:$0xff]  }
  0xc6   :  { %1509 = vmatprep.mubr.bf16.mxu1 %v3185_v44  ;;  %v2813_v44 = vld [vmem:[#allocation5 + $0x42c] ss:$16 sps:$4 sm:$0xff]  }
  0xc7   :  { %1437 = vmatpush1.bf16.msra.mxu0 %v2778_v27  ;;  %v2871_v26 = vld [vmem:[#allocation8 + $0x60] ss:$8 sps:$4 sm:$0xff]   ;;  %v2876_v27 = vld [vmem:[#allocation8 + $0x54] ss:$8 sps:$4 sm:$0xff]  }
  0xc8   :  { %1480 = vmatpush1.bf16.msra.mxu1 %v2781_v28  ;;  %1438 = vmatprep.subr.bf16.mxu0 %v2786_v29  ;;  %v2874_v28 = vld [vmem:[#allocation8 + $0x50] ss:$8 sps:$4 sm:$0xff]   ;;  %v2879_v29 = vld [vmem:[#allocation8 + $0x44] ss:$8 sps:$4 sm:$0xff]  }
  0xc9   :  { %1481 = vmatprep.subr.bf16.mxu1 %v2789_v30  ;;  %v2877_v30 = vld [vmem:[#allocation8 + $0x40] ss:$8 sps:$4 sm:$0xff]  }
  0xcb   :  { %1439 = vmatpush1.bf16.msra.mxu0 %v2784_v31  ;;  %v2882_v31 = vld [vmem:[#allocation8 + $0x34] ss:$8 sps:$4 sm:$0xff]  }
  0xcc   :  { %1482 = vmatpush1.bf16.msra.mxu1 %v2787_v32  ;;  %1440 = vmatprep.subr.bf16.mxu0 %v2792_v33  ;;  %v2880_v32 = vld [vmem:[#allocation8 + $0x30] ss:$8 sps:$4 sm:$0xff]   ;;  %v2885_v33 = vld [vmem:[#allocation8 + $0x24] ss:$8 sps:$4 sm:$0xff]  }
  0xcd   :  { %1483 = vmatprep.subr.bf16.mxu1 %v2795_v34  ;;  %v2916_v34 = vld [vmem:[#allocation8 + $0x170] ss:$8 sps:$4 sm:$0xff]  }
  0xcf   :  { %1441 = vmatpush1.bf16.msra.mxu0 %v2790_v12  ;;  %v2888_v12 = vld [vmem:[#allocation8 + $0x14] ss:$8 sps:$4 sm:$0xff]  }
  0xd0   :  { %1484 = vmatpush1.bf16.msra.mxu1 %v2793_v35  ;;  %1442 = vmatprep.subr.bf16.mxu0 %v2798_v36  ;;  %v2921_v35 = vld [vmem:[#allocation8 + $0x164] ss:$8 sps:$4 sm:$0xff]   ;;  %v2919_v36 = vld [vmem:[#allocation8 + $0x160] ss:$8 sps:$4 sm:$0xff]  }
  0xd1   :  { %1485 = vmatprep.subr.bf16.mxu1 %v2801_v37  ;;  %v2886_v37 = vld [vmem:[#allocation8 + $0x10] ss:$8 sps:$4 sm:$0xff]  }
  0xd3   :  { %1443 = vmatpush1.bf16.msra.mxu0 %v2796_v38  ;;  %v2924_v38 = vld [vmem:[#allocation8 + $0x154] ss:$8 sps:$4 sm:$0xff]  }
  0xd4   :  { %1486 = vmatpush1.bf16.msra.mxu1 %v2799_v39  ;;  %1444 = vmatprep.subr.bf16.mxu0 %v2804_v54  ;;  %v2891_v39 = vld [vmem:[#allocation8 + $0x4] ss:$8 sps:$4 sm:$0xff]   ;;  %v2922_v54 = vld [vmem:[#allocation8 + $0x150] ss:$8 sps:$4 sm:$0xff]  }
  0xd5   :  { %1487 = vmatprep.subr.bf16.mxu1 %v2807_v40  ;;  %v2889_v40 = vld [vmem:[#allocation8] ss:$8 sps:$4 sm:$0xff]  }
  0xd7   :  { %1445 = vmatpush1.bf16.msra.mxu0 %v2802_v41  ;;  %v2927_v41 = vld [vmem:[#allocation8 + $0x144] ss:$8 sps:$4 sm:$0xff]  }
  0xd8   :  { %1488 = vmatpush1.bf16.msra.mxu1 %v2805_v42  ;;  %1446 = vmatprep.subr.bf16.mxu0 %v2810_v43  ;;  %v2894_v42 = vld [vmem:[#allocation8 + $0xf4] ss:$8 sps:$4 sm:$0xff]   ;;  %v2925_v43 = vld [vmem:[#allocation8 + $0x140] ss:$8 sps:$4 sm:$0xff]  }
  0xd9   :  { %1489 = vmatprep.subr.bf16.mxu1 %v2813_v44  ;;  %v2892_v44 = vld [vmem:[#allocation8 + $0xf0] ss:$8 sps:$4 sm:$0xff]  }
  0xdb   :  { %1447 = vmatpush1.bf16.msra.mxu0 %v2808_v45  ;;  %v2930_v45 = vld [vmem:[#allocation8 + $0x134] ss:$8 sps:$4 sm:$0xff]  }
  0xdc   :  { %1490 = vmatpush1.bf16.msra.mxu1 %v2811_v46  ;;  %1448 = vmatprep.subr.bf16.mxu0 %v2816_v47  ;;  %v2897_v46 = vld [vmem:[#allocation8 + $0xe4] ss:$8 sps:$4 sm:$0xff]   ;;  %v2928_v47 = vld [vmem:[#allocation8 + $0x130] ss:$8 sps:$4 sm:$0xff]  }
  0xdd   :  { %1491 = vmatprep.subr.bf16.mxu1 %v2819_v48  ;;  %v2895_v48 = vld [vmem:[#allocation8 + $0xe0] ss:$8 sps:$4 sm:$0xff]  }
  0xdf   :  { %1449 = vmatpush1.bf16.msra.mxu0 %v2814_v49  ;;  %v2933_v49 = vld [vmem:[#allocation8 + $0x124] ss:$8 sps:$4 sm:$0xff]  }
  0xe0   :  { %1492 = vmatpush1.bf16.msra.mxu1 %v2817_v50  ;;  %1450 = vmatprep.subr.bf16.mxu0 %v2822_v51  ;;  %v2900_v50 = vld [vmem:[#allocation8 + $0xd4] ss:$8 sps:$4 sm:$0xff]   ;;  %v2931_v51 = vld [vmem:[#allocation8 + $0x120] ss:$8 sps:$4 sm:$0xff]  }
  0xe1   :  { %1493 = vmatprep.subr.bf16.mxu1 %v2825_v52  ;;  %v2898_v52 = vld [vmem:[#allocation8 + $0xd0] ss:$8 sps:$4 sm:$0xff]  }
  0xe3   :  { %1451 = vmatpush2.bf16.msra.mxu0 %v2820_v53  ;;  %v2936_v53 = vld [vmem:[#allocation8 + $0x114] ss:$8 sps:$4 sm:$0xff]  }
  0xe4   :  { %1494 = vmatpush2.bf16.msra.mxu1 %v2823_v55  ;;  %1452 = vmatprep.subr.bf16.mxu0 %v2828_v56  ;;  %v2903_v55 = vld [vmem:[#allocation8 + $0xc4] ss:$8 sps:$4 sm:$0xff]   ;;  %v2934_v56 = vld [vmem:[#allocation8 + $0x110] ss:$8 sps:$4 sm:$0xff]  }
  0xe5   :  { %1495 = vmatprep.subr.bf16.mxu1 %v2831_v57  ;;  %v2901_v57 = vld [vmem:[#allocation8 + $0xc0] ss:$8 sps:$4 sm:$0xff]  }
  0xe7   :  { %1453 = vmatpush2.bf16.msra.mxu0 %v2826_v58  ;;  %v2939_v58 = vld [vmem:[#allocation8 + $0x104] ss:$8 sps:$4 sm:$0xff]  }
  0xe8   :  { %1496 = vmatpush2.bf16.msra.mxu1 %v2829_v59  ;;  %1454 = vmatprep.subr.bf16.mxu0 %v2834_v60  ;;  %v2906_v59 = vld [vmem:[#allocation8 + $0xb4] ss:$8 sps:$4 sm:$0xff]   ;;  %v2937_v60 = vld [vmem:[#allocation8 + $0x100] ss:$8 sps:$4 sm:$0xff]  }
  0xe9   :  { %1497 = vmatprep.subr.bf16.mxu1 %v2837_v61  ;;  %v2904_v61 = vld [vmem:[#allocation8 + $0xb0] ss:$8 sps:$4 sm:$0xff]  }
  0xeb   :  { %1455 = vmatpush2.bf16.msra.mxu0 %v2832_v62  ;;  %v2942_v62 = vld [vmem:[#allocation8 + $0x1f4] ss:$8 sps:$4 sm:$0xff]  }
  0xec   :  { %1498 = vmatpush2.bf16.msra.mxu1 %v2835_v63  ;;  %1456 = vmatprep.subr.bf16.mxu0 %v2840_v0  ;;  %v2909_v63 = vld [vmem:[#allocation8 + $0xa4] ss:$8 sps:$4 sm:$0xff]   ;;  %v2940_v0 = vld [vmem:[#allocation8 + $0x1f0] ss:$8 sps:$4 sm:$0xff]  }
  0xed   :  { %1499 = vmatprep.subr.bf16.mxu1 %v2843_v1  ;;  %v2907_v1 = vld [vmem:[#allocation8 + $0xa0] ss:$8 sps:$4 sm:$0xff]  }
  0xef   :  { %1457 = vmatpush2.bf16.msra.mxu0 %v2838_v2  ;;  %v2945_v2 = vld [vmem:[#allocation8 + $0x1e4] ss:$8 sps:$4 sm:$0xff]  }
  0xf0   :  { %1500 = vmatpush2.bf16.msra.mxu1 %v2841_v3  ;;  %1458 = vmatprep.subr.bf16.mxu0 %v2846_v4  ;;  %v2912_v3 = vld [vmem:[#allocation8 + $0x94] ss:$8 sps:$4 sm:$0xff]   ;;  %v2943_v4 = vld [vmem:[#allocation8 + $0x1e0] ss:$8 sps:$4 sm:$0xff]  }
  0xf1   :  { %1501 = vmatprep.subr.bf16.mxu1 %v2849_v5  ;;  %v2910_v5 = vld [vmem:[#allocation8 + $0x90] ss:$8 sps:$4 sm:$0xff]  }
  0xf3   :  { %1459 = vmatpush2.bf16.msra.mxu0 %v2844_v6  ;;  %v2948_v6 = vld [vmem:[#allocation8 + $0x1d4] ss:$8 sps:$4 sm:$0xff]  }
  0xf4   :  { %1502 = vmatpush2.bf16.msra.mxu1 %v2847_v7  ;;  %1460 = vmatprep.subr.bf16.mxu0 %v2852_v8  ;;  %v2915_v7 = vld [vmem:[#allocation8 + $0x84] ss:$8 sps:$4 sm:$0xff]   ;;  %v2946_v8 = vld [vmem:[#allocation8 + $0x1d0] ss:$8 sps:$4 sm:$0xff]  }
  0xf5   :  { %1503 = vmatprep.subr.bf16.mxu1 %v2855_v9  ;;  %v2913_v9 = vld [vmem:[#allocation8 + $0x80] ss:$8 sps:$4 sm:$0xff]  }
  0xf7   :  { %1461 = vmatpush2.bf16.msra.mxu0 %v2850_v10  ;;  %v2951_v10 = vld [vmem:[#allocation8 + $0x1c4] ss:$8 sps:$4 sm:$0xff]  }
  0xf8   :  { %1504 = vmatpush2.bf16.msra.mxu1 %v2853_v11  ;;  %1462 = vmatprep.subr.bf16.mxu0 %v2858_v14  ;;  %v2949_v11 = vld [vmem:[#allocation8 + $0x1c0] ss:$8 sps:$4 sm:$0xff]   ;;  %v2954_v14 = vld [vmem:[#allocation8 + $0x1b4] ss:$8 sps:$4 sm:$0xff]  }
  0xf9   :  { %1505 = vmatprep.subr.bf16.mxu1 %v2861_v15  ;;  %v2952_v15 = vld [vmem:[#allocation8 + $0x1b0] ss:$8 sps:$4 sm:$0xff]  }
  0xfb   :  { %1463 = vmatpush2.bf16.msra.mxu0 %v2856_v16  ;;  %v2957_v16 = vld [vmem:[#allocation8 + $0x1a4] ss:$8 sps:$4 sm:$0xff]  }
  0xfc   :  { %1506 = vmatpush2.bf16.msra.mxu1 %v2859_v17  ;;  %1464 = vmatprep.subr.bf16.mxu0 %v2864_v18  ;;  %v2955_v17 = vld [vmem:[#allocation8 + $0x1a0] ss:$8 sps:$4 sm:$0xff]   ;;  %v2960_v18 = vld [vmem:[#allocation8 + $0x194] ss:$8 sps:$4 sm:$0xff]  }
  0xfd   :  { %1507 = vmatprep.subr.bf16.mxu1 %v2867_v19  ;;  %v2958_v19 = vld [vmem:[#allocation8 + $0x190] ss:$8 sps:$4 sm:$0xff]  }
  0xff   :  { %1465 = vmatpush2.bf16.msra.mxu0 %v2862_v20  ;;  %v2961_v20 = vld [vmem:[#allocation8 + $0x180] ss:$8 sps:$4 sm:$0xff]  }
 0x100   :  { %1508 = vmatpush2.bf16.msra.mxu1 %v2865_v21  ;;  %1978 = vmatprep.subr.bf16.mxu0 %v2870_v23  ;;  %v2963_v21 = vld [vmem:[#allocation8 + $0x184] ss:$8 sps:$4 sm:$0xff]   ;;  %v3121_v23 = vmov 1966171168  }
 0x102   :  { %1467 = vmatmul.mubr.bf16.vlgmr.msra.gmra.mxu0 %v3181_v13  ;;  %v2883_v13 = vld [vmem:[#allocation8 + $0x20] ss:$8 sps:$4 sm:$0xff]  }
 0x103   :  { %1510 = vmatmul.mubr.bf16.vlgmr.msra.gmra.mxu1 %v3188_v22  ;;  %1979 = vmatpush1.bf16.msra.mxu0 %v2868_v24  ;;  %v2918_v22 = vld [vmem:[#allocation8 + $0x174] ss:$8 sps:$4 sm:$0xff]   ;;  %v1535_v24 = vunpack.c.l.s4 %v3121_v23 }
 0x104   :  { %1980 = vmatprep.subr.bf16.mxu0 %v2873_v25  ;;  %2021 = vmatprep.subr.bf16.mxu1 %v2918_v22  ;;  %v1537_v25 = vlaneseq }
 0x105   :  { %2022 = vmatpush1.bf16.msra.mxu1 %v2916_v34 }
 0x106   :  { %2023 = vmatprep.subr.bf16.mxu1 %v2921_v35 }
 0x107   :  { %1981 = vmatpush1.bf16.msra.mxu0 %v2871_v26 }
 0x108   :  { %1982 = vmatprep.subr.bf16.mxu0 %v2876_v27  ;;  %v1536_v27 = vunpack.c.0.s8 %v1535_v24 }
 0x109   :  { %2024 = vmatpush1.bf16.msra.mxu1 %v2919_v36 }
 0x10a   :  { %2025 = vmatprep.subr.bf16.mxu1 %v2924_v38 }
 0x10b   :  { %1983 = vmatpush1.bf16.msra.mxu0 %v2874_v28  ;;  %v1538_v28 = vshrl.u32 %v1537_v25, 7 }
 0x10c   :  { %1984 = vmatprep.subr.bf16.mxu0 %v2879_v29 }
 0x10d   :  { %2026 = vmatpush1.bf16.msra.mxu1 %v2922_v54 }
 0x10e   :  { %2027 = vmatprep.subr.bf16.mxu1 %v2927_v41 }
 0x10f   :  { %1985 = vmatpush1.bf16.msra.mxu0 %v2877_v30 }
 0x110   :  { %1986 = vmatprep.subr.bf16.mxu0 %v2882_v31  ;;  %v2461_v31 = vld.sshfl [vmem:[#allocation7] sm:$0x33 pattern:$0x75316420] }
 0x111   :  { %2028 = vmatpush1.bf16.msra.mxu1 %v2925_v43  ;;  %v1533_v34 = vcombine.high %v2461_v31, %v2461_v31 }
 0x112   :  { %2029 = vmatprep.subr.bf16.mxu1 %v2930_v45 }
 0x113   :  { %1987 = vmatpush1.bf16.msra.mxu0 %v2880_v32  ;;  %v1539_v32 = vsub.s32 %v1536_v27, %v1538_v28 }
 0x114   :  { %1988 = vmatprep.subr.bf16.mxu0 %v2885_v33 }
 0x115   :  { %2030 = vmatpush1.bf16.msra.mxu1 %v2928_v47  ;;  %v1540_v22 = vrot.slane %v2461_v31, %v1539_v32  ;;  %v1547_v36 = vrot.slane %v1533_v34, %v1539_v32 }
 0x116   :  { %2031 = vmatprep.subr.bf16.mxu1 %v2933_v49 }
 0x117   :  { %1989 = vmatpush1.bf16.msra.mxu0 %v2883_v13  ;;  %v1551_v38 = vpack.i.b16 %v1540_v22, %v1540_v22  ;;  %v1558_v43 = vpack.i.b16 %v1547_v36, %v1547_v36 }
 0x118   :  { %1990 = vmatprep.subr.bf16.mxu0 %v2888_v12 }
 0x119   :  { %2032 = vmatpush1.bf16.msra.mxu1 %v2931_v51 }
 0x11a   :  { %2033 = vmatprep.subr.bf16.mxu1 %v2936_v53 }
 0x11b   :  { %1991 = vmatpush1.bf16.msra.mxu0 %v2886_v37 }
 0x11c   :  { %1992 = vmatprep.subr.bf16.mxu0 %v2891_v39  ;;  %v1555_v39 = vsub.s32 0, %v1538_v28 }
 0x11d   :  { %2034 = vmatpush1.bf16.msra.mxu1 %v2934_v56 }
 0x11e   :  { %2035 = vmatprep.subr.bf16.mxu1 %v2939_v58  ;;  %v1556_v45 = vrot.slane %v1551_v38, %v1555_v39  ;;  %v2969_v38 = vld [vmem:[#allocation10 + $0x28] sm:$0xff]  }
 0x11f   :  { %1993 = vmatpush1.bf16.msra.mxu0 %v2889_v40 }
 0x120   :  { %1994 = vmatprep.subr.bf16.mxu0 %v2894_v42 }
 0x121   :  { %2036 = vmatpush1.bf16.msra.mxu1 %v2937_v60 }
 0x122   :  { %2037 = vmatprep.subr.bf16.mxu1 %v2942_v62 }
 0x123   :  { %1995 = vmatpush2.bf16.msra.mxu0 %v2892_v44 }
 0x124   :  { %1996 = vmatprep.subr.bf16.mxu0 %v2897_v46 }
 0x125   :  { %2038 = vmatpush2.bf16.msra.mxu1 %v2940_v0 }
 0x126   :  { %2039 = vmatprep.subr.bf16.mxu1 %v2945_v2 }
 0x127   :  { %1997 = vmatpush2.bf16.msra.mxu0 %v2895_v48 }
 0x128   :  { %1998 = vmatprep.subr.bf16.mxu0 %v2900_v50 }
 0x129   :  { %2040 = vmatpush2.bf16.msra.mxu1 %v2943_v4 }
 0x12a   :  { %2041 = vmatprep.subr.bf16.mxu1 %v2948_v6  ;;  %v1549_v6 = vcombine.high %v1547_v36, %v1547_v36  ;;  %v2967_v36 = vld [vmem:[#allocation10 + $0x30] sm:$0xff]  }
 0x12b   :  { %1999 = vmatpush2.bf16.msra.mxu0 %v2898_v52 }
 0x12c   :  { %2000 = vmatprep.subr.bf16.mxu0 %v2903_v55  ;;  %v1563_v55 = vrot.slane %v1558_v43, %v1555_v39  ;;  %v2975_v43 = vld [vmem:[#allocation10 + $0x10] sm:$0xff]  }
 0x12d   :  { %2042 = vmatpush2.bf16.msra.mxu1 %v2946_v8 }
 0x12e   :  { %2043 = vmatprep.subr.bf16.mxu1 %v2951_v10 }
 0x12f   :  { %2001 = vmatpush2.bf16.msra.mxu0 %v2901_v57 }
 0x130   :  { %2002 = vmatprep.subr.bf16.mxu0 %v2906_v59 }
 0x131   :  { %2044 = vmatpush2.bf16.msra.mxu1 %v2949_v11 }
 0x132   :  { %2045 = vmatprep.subr.bf16.mxu1 %v2954_v14 }
 0x133   :  { %2003 = vmatpush2.bf16.msra.mxu0 %v2904_v61 }
 0x134   :  { %2004 = vmatprep.subr.bf16.mxu0 %v2909_v63 }
 0x135   :  { %2046 = vmatpush2.bf16.msra.mxu1 %v2952_v15 }
 0x136   :  { %2047 = vmatprep.subr.bf16.mxu1 %v2957_v16 }
 0x137   :  { %2005 = vmatpush2.bf16.msra.mxu0 %v2907_v1 }
 0x138   :  { %2006 = vmatprep.subr.bf16.mxu0 %v2912_v3  ;;  %v1548_v3 = vcombine.high %v1540_v22, %v1540_v22  ;;  %v2964_v22 = vld [vmem:[#allocation10 + $0x78] sm:$0xff]  }
 0x139   :  { %2048 = vmatpush2.bf16.msra.mxu1 %v2955_v17  ;;  %v1572_v17 = vpack.i.b16 %v1549_v6, %v1549_v6 }
 0x13a   :  { %2049 = vmatprep.subr.bf16.mxu1 %v2960_v18  ;;  %v1565_v10 = vpack.i.b16 %v1548_v3, %v1548_v3 }
 0x13b   :  { %2007 = vmatpush2.bf16.msra.mxu0 %v2910_v5  ;;  %v1577_v28 = vrot.slane %v1572_v17, %v1555_v39 }
 0x13c   :  { %2008 = vmatprep.subr.bf16.mxu0 %v2915_v7 }
 0x13d   :  { %2050 = vmatpush2.bf16.msra.mxu1 %v2958_v19 }
 0x13e   :  { %2051 = vmatprep.subr.bf16.mxu1 %v2963_v21  ;;  %v1570_v21 = vrot.slane %v1565_v10, %v1555_v39  ;;  %v2970_v39 = vld [vmem:[#allocation10 + $0x60] sm:$0xff]  }
 0x13f   :  { %2009 = vmatpush2.bf16.msra.mxu0 %v2913_v9 }
 0x140   :  { %2543 = vmatprep.subr.bf16.mxu0 %v2964_v22 }
 0x141   :  { %2052 = vmatpush2.bf16.msra.mxu1 %v2961_v20 }
 0x142   :  { %v1296_v26 = vpop.f32.mrf.mxu0 }
 0x143   :  { %v1339_v29 = vpop.f32.mrf.mxu1 }
 0x144   :  { %v1298_v30 = vpop.f32.mrf.mxu0  ;;  %v1340_v41 = vadd.f32 %v1339_v29, %v1296_v26 }
 0x145   :  { %v1341_v33 = vpop.f32.mrf.mxu1 }
 0x146   :  { %v1300_v13 = vpop.f32.mrf.mxu0  ;;  %v1342_v46 = vadd.f32 %v1341_v33, %v1298_v30 }
 0x147   :  { %v1343_v12 = vpop.f32.mrf.mxu1 }
 0x148   :  { %v1302_v35 = vpop.f32.mrf.mxu0  ;;  %v1344_v42 = vadd.f32 %v1343_v12, %v1300_v13  ;;  %v2965_v12 = vld [vmem:[#allocation10 + $0x38] sm:$0xff]  }
 0x149   :  { %v1345_v54 = vpop.f32.mrf.mxu1 }
 0x14a   :  { %v1346_v47 = vadd.f32 %v1345_v54, %v1302_v35  ;;  %v2966_v35 = vld [vmem:[#allocation10 + $0x70] sm:$0xff]   ;;  %v2971_v54 = vld [vmem:[#allocation10 + $0x20] sm:$0xff]  }
 0x182   :  { %v1382_v37 = vpop.f32.mrf.mxu0 }
 0x183   :  { %v1383_v48 = vadd.f32 %v1382_v37, %v1340_v41  ;;  %v1425_v63 = vpop.f32.mrf.mxu1  ;;  %v2968_v37 = vld [vmem:[#allocation10 + $0x68] sm:$0xff]   ;;  %v2973_v41 = vld [vmem:[#allocation10 + $0x18] sm:$0xff]  }
 0x184   :  { %v1384_v40 = vpop.f32.mrf.mxu0 }
 0x185   :  { %v1385_v51 = vadd.f32 %v1384_v40, %v1342_v46  ;;  %v1427_v0 = vpop.f32.mrf.mxu1  ;;  %v2972_v40 = vld [vmem:[#allocation10 + $0x58] sm:$0xff]   ;;  %v2978_v46 = vld [vmem:[#allocation10 + $0x40] sm:$0xff]  }
 0x186   :  { %v1386_v44 = vpop.f32.mrf.mxu0 }
 0x187   :  { %v1387_v49 = vadd.f32 %v1386_v44, %v1344_v42  ;;  %v1429_v1 = vpop.f32.mrf.mxu1  ;;  %v2974_v42 = vld [vmem:[#allocation10 + $0x50] sm:$0xff]   ;;  %v2976_v44 = vld [vmem:[#allocation10 + $0x48] sm:$0xff]  }
 0x188   :  { %v1388_v50 = vpop.f32.mrf.mxu0 }
 0x189   :  { %v1520_v52 = vpack.c.bf16 %v1387_v49, %v1383_v48  ;;  %v1389_v53 = vadd.f32 %v1388_v50, %v1346_v47  ;;  %v1431_v2 = vpop.f32.mrf.mxu1  ;;  %v2979_v47 = vld [vmem:[#allocation10] sm:$0xff]  }
 0x18b   :  { %v1578_v56 = vadd.bf16 %v1556_v45, %v1520_v52  ;;  %v1521_v57 = vpack.c.bf16 %v1389_v53, %v1385_v51  ;;  %v2977_v45 = vld [vmem:[#allocation10 + $0x8] sm:$0xff]  }
 0x18d   :  { %v1579_v58 = vadd.bf16 %v1563_v55, %v1521_v57  ;;  %v1586_v59 = vmul.bf16 1045249613, %v1578_v56  ;;  %vm1582_vm1 = vcmp.ge.bf16.partialorder %v1578_v56, 0 }
 0x18f   :  { %vm1583_vm0 = vcmp.ge.bf16.partialorder %v1579_v58, 0  ;;  %v1587_v60 = vmul.bf16 1045249613, %v1579_v58  ;;  %v1590_v62 = vsel %vm1582_vm1, %v1578_v56, %v1586_v59 }
 0x191   :  { %v1591_v61 = vsel %vm1583_vm0, %v1579_v58, %v1587_v60 }
 0x192   :  { %2010 = vmatprep.mubr.bf16.mxu0 %v1591_v61 }
 0x193   :  { %2011 = vmatmul.mubr.bf16.vlgmr.msra.gmra.mxu0 %v1590_v62 }
 0x194   :  { %2544 = vmatpush3.bf16.msra.mxu0 %v2965_v12 }
 0x195   :  { %2545 = vmatprep.subr.bf16.mxu0 %v2966_v35 }
 0x198   :  { %2546 = vmatpush3.bf16.msra.mxu0 %v2967_v36 }
 0x199   :  { %2547 = vmatprep.subr.bf16.mxu0 %v2968_v37 }
 0x19c   :  { %2548 = vmatpush3.bf16.msra.mxu0 %v2969_v38 }
 0x19d   :  { %2549 = vmatprep.subr.bf16.mxu0 %v2970_v39 }
 0x1a0   :  { %2550 = vmatpush3.bf16.msra.mxu0 %v2971_v54 }
 0x1a1   :  { %2551 = vmatprep.subr.bf16.mxu0 %v2972_v40 }
 0x1a4   :  { %2552 = vmatpush3.bf16.msra.mxu0 %v2973_v41 }
 0x1a5   :  { %2553 = vmatprep.subr.bf16.mxu0 %v2974_v42 }
 0x1a8   :  { %2554 = vmatpush3.bf16.msra.mxu0 %v2975_v43 }
 0x1a9   :  { %2555 = vmatprep.subr.bf16.mxu0 %v2976_v44 }
 0x1ac   :  { %2556 = vmatpush3.bf16.msra.mxu0 %v2977_v45 }
 0x1ad   :  { %2557 = vmatprep.subr.bf16.mxu0 %v2978_v46 }
 0x1b0   :  { %2558 = vmatpush3.bf16.msra.mxu0 %v2979_v47 }
 0x1c2   :  { %v1468_v4 = vpop.f32.mrf.mxu0 }
 0x1c3   :  { %v1511_v5 = vpop.f32.mrf.mxu1  ;;  %v1469_v9 = vadd.f32 %v1468_v4, %v1425_v63  ;;  %v2526_v4 = vld [vmem:[%s3210_s5] ss:$0 sm:$0xff] }
 0x1c4   :  { %v1470_v7 = vpop.f32.mrf.mxu0 }
 0x1c5   :  { %v1513_v8 = vpop.f32.mrf.mxu1  ;;  %v1471_v15 = vadd.f32 %v1470_v7, %v1427_v0  ;;  %v1512_v19 = vadd.f32 %v1511_v5, %v1469_v9 }
 0x1c6   :  { %v1472_v11 = vpop.f32.mrf.mxu0 }
 0x1c7   :  { %v1515_v14 = vpop.f32.mrf.mxu1  ;;  %v1473_v16 = vadd.f32 %v1472_v11, %v1429_v1  ;;  %v1514_v25 = vadd.f32 %v1513_v8, %v1471_v15 }
 0x1c8   :  { %v1474_v18 = vpop.f32.mrf.mxu0 }
 0x1c9   :  { %v1516_v20 = vadd.f32 %v1515_v14, %v1473_v16  ;;  %v1475_v23 = vadd.f32 %v1474_v18, %v1431_v2  ;;  %v1517_v24 = vpop.f32.mrf.mxu1 }
 0x1cb   :  { %v1522_v26 = vpack.c.bf16 %v1516_v20, %v1512_v19  ;;  %v1518_v27 = vadd.f32 %v1517_v24, %v1475_v23 }
 0x1cd   :  { %v1580_v29 = vadd.bf16 %v1570_v21, %v1522_v26  ;;  %v1523_v30 = vpack.c.bf16 %v1518_v27, %v1514_v25 }
 0x1cf   :  { %v1581_v31 = vadd.bf16 %v1577_v28, %v1523_v30  ;;  %v1588_v32 = vmul.bf16 1045249613, %v1580_v29  ;;  %vm1584_vm3 = vcmp.ge.bf16.partialorder %v1580_v29, 0 }
 0x1d1   :  { %vm1585_vm2 = vcmp.ge.bf16.partialorder %v1581_v31, 0  ;;  %v1589_v33 = vmul.bf16 1045249613, %v1581_v31  ;;  %v1592_v34 = vsel %vm1584_vm3, %v1580_v29, %v1588_v32 }
 0x1d3   :  { %v1593_v13 = vsel %vm1585_vm2, %v1581_v31, %v1589_v33 }
 0x1d4   :  { %2053 = vmatprep.mubr.bf16.mxu1 %v1593_v13 }
 0x1d5   :  { %2054 = vmatmul.mubr.bf16.vlgmr.msra.gmra.mxu1 %v1592_v34 }
 0x253   :  { %v2012_v48 = vpop.f32.mrf.mxu0 }
 0x255   :  { %v2014_v49 = vpop.f32.mrf.mxu0 }
 0x257   :  { %v2016_v51 = vpop.f32.mrf.mxu0 }
 0x259   :  { %v2018_v57 = vpop.f32.mrf.mxu0 }
 0x295   :  { %v2055_v50 = vpop.f32.mrf.mxu1 }
 0x296   :  { %v2056_v55 = vadd.f32 %v2055_v50, %v2012_v48 }
 0x297   :  { %v2057_v52 = vpop.f32.mrf.mxu1 }
 0x298   :  { %v2058_v59 = vadd.f32 %v2057_v52, %v2014_v49 }
 0x299   :  { %v2059_v53 = vpop.f32.mrf.mxu1 }
 0x29a   :  { %v2060_v56 = vadd.f32 %v2059_v53, %v2016_v51 }
 0x29b   :  { %v2061_v58 = vpop.f32.mrf.mxu1 }
 0x29c   :  { %v2064_v60 = vpack.c.bf16 %v2060_v56, %v2056_v55  ;;  %v2062_v61 = vadd.f32 %v2061_v58, %v2018_v57 }
 0x29e   :  { %v2065_v62 = vpack.c.bf16 %v2062_v61, %v2058_v59  ;;  %v2068_v63 = vmul.bf16 1045249613, %v2064_v60  ;;  %vm2066_vm5 = vcmp.ge.bf16.partialorder %v2064_v60, 0 }
 0x2a0   :  { %vm2067_vm4 = vcmp.ge.bf16.partialorder %v2065_v62, 0  ;;  %v2069_v0 = vmul.bf16 1045249613, %v2065_v62  ;;  %v2070_v2 = vsel %vm2066_vm5, %v2064_v60, %v2068_v63 }
 0x2a2   :  { %v2071_v1 = vsel %vm2067_vm4, %v2065_v62, %v2069_v0 }
 0x2a3   :  { %2239 = vmatprep.mubr.bf16.mxu0 %v2071_v1 }
 0x2a4   :  { %2240 = vmatmul.mubr.bf16.vlgmr.msra.gmra.mxu0 %v2070_v2 }
 0x364   :  { %v2559_v3 = vpop.f32.mrf.mxu0 }
 0x366   :  { %v2560_v5 = vpop.f32.mrf.mxu0 }
 0x367   :  { %v2561_v6 = vadd.f32 %v2560_v5, %v2559_v3 }
 0x368   :  { %v2562_v7 = vpop.f32.mrf.mxu0 }
 0x369   :  { %v2242_v8 = vadd.f32 %v2561_v6, %v2526_v4 }
 0x36a   :  { %v2563_v9 = vpop.f32.mrf.mxu0 }
 0x36b   :  { %2248 = vst [vmem:[#allocation11] sm:$0xff] %v2242_v8  ;;  %v2564_v10 = vadd.f32 %v2563_v9, %v2562_v7 }
 0x36d   :  { %v2245_v11 = vadd.f32 %v2564_v10, %v2526_v4 }
 0x36f   :  { %2249 = vst [vmem:[#allocation11 + $0x8] sm:$0xff] %v2245_v11 }
 0x370   :  { %3091 = shalt.err (!%p3088_p1)
}
 0x371   :  { %2261 = dma.vmem_to_hbm [thread:$0]  %s2256_s28, 256, %s3211_s6, [#allocation4], %s3112_s7, %s3112_s7, %s3113_s8  }
 0x372   :  { %3106 = dma.done.wait [#allocation4], 256  }
 0x373   :  { %3107 = vsyncadd [#allocation4], 4294967040 }
 0x374   :  { %2265 = vsyncpa [#allocation3], 1 }
 0x375   :  { %2266 = vsyncpa [#allocation6], 1 }
 0x376   :  { %2267 = vsyncpa [#allocation9], 1 }
 0x377   :  { %2268 = vsyncpa [#allocation4], 1 }

</bundles_post_ra>
